<compile_context>
chip_gen: v6e
topology: v6e:2x2x1
jax: 0.10.0
libtpu: 0.0.40
codegen_flags: <defaults>
</compile_context>

<pallas_src>
import functools

import jax
import jax.numpy as jnp
from jax.experimental import pallas as pl
from jax.experimental.pallas import tpu as pltpu

EPS = 1e-5


# ----------------------------- Pallas kernel ------------------------------ #

def _batchnorm(h, gamma, beta):
    """Training-mode BatchNorm1d over the flattened (B*N, C) batch dim, one pass."""
    n = h.shape[0]
    inv_n = 1.0 / n
    mean = jnp.sum(h, axis=0, keepdims=True) * inv_n
    ex2 = jnp.sum(h * h, axis=0, keepdims=True) * inv_n
    var = ex2 - mean * mean                      # biased variance (PyTorch training mode)
    scale = jax.lax.rsqrt(var + EPS) * gamma     # fold gamma into the normalization scale
    return (h - mean) * scale + beta


def encoder_kernel(x_ref, mask_ref, wemb_ref, bemb_ref,
                   wqkv_ref, bqkv_ref, wo_ref, bo_ref,
                   g1_ref, be1_ref, g2_ref, be2_ref,
                   w1_ref, b1_ref, w2_ref, b2_ref,
                   out_ref, *, num_heads, num_layers):
    x = x_ref[...]                                   # (B, N, F) f32
    B, N, F = x.shape
    E = out_ref.shape[-1]
    hd = E // num_heads
    BN = B * N

    # ---- depot/node embedding: one fused matmul then a per-node select ----
    x2 = x.reshape(BN, F)
    emb = jnp.dot(x2, wemb_ref[...], preferred_element_type=jnp.float32) + bemb_ref[...]
    mask = mask_ref[...]                             # (BN, 1), 1.0 at depot rows
    h = jnp.where(mask > 0.5, emb[:, :E], emb[:, E:2 * E])      # (BN, E) f32

    # ---- attention layers (all weights VMEM-resident, static unrolled loop) ----
    for l in range(num_layers):
        hb = h.astype(jnp.bfloat16)
        # packed QKV projection; 1/sqrt(hd) already folded into the Q block host-side
        qkv = (jnp.dot(hb, wqkv_ref[l], preferred_element_type=jnp.float32)
               + bqkv_ref[l])                        # (BN, 3E) f32

        head_outs = []
        for hh in range(num_heads):                  # static unrolled head loop
            qh = qkv[:, 0 * E + hh * hd:0 * E + (hh + 1) * hd].reshape(B, N, hd)
            kh = qkv[:, 1 * E + hh * hd:1 * E + (hh + 1) * hd].reshape(B, N, hd)
            vh = qkv[:, 2 * E + hh * hd:2 * E + (hh + 1) * hd].reshape(B, N, hd)
            s = jnp.einsum('bqd,bkd->bqk', qh, kh,
                           preferred_element_type=jnp.float32)   # (B, N, N)
            s = s - jnp.max(s, axis=-1, keepdims=True)
            p = jnp.exp(s)
            p = p * pl.reciprocal(jnp.sum(p, axis=-1, keepdims=True), approx=True)
            head_outs.append(
                jnp.einsum('bqk,bkd->bqd', p, vh,
                           preferred_element_type=jnp.float32))  # (B, N, hd)

        # one full-width out-projection on the concatenated heads (single MXU matmul)
        o = jnp.concatenate(head_outs, axis=-1).reshape(BN, E)
        attn = (jnp.dot(o.astype(jnp.bfloat16), wo_ref[l],
                        preferred_element_type=jnp.float32) + bo_ref[l])

        # residual + BatchNorm 1
        h1 = _batchnorm(h + attn, g1_ref[l], be1_ref[l])

        # feed-forward: Linear -> ReLU -> Linear
        f = jnp.maximum(
            jnp.dot(h1.astype(jnp.bfloat16), w1_ref[l],
                    preferred_element_type=jnp.float32) + b1_ref[l], 0.0)
        f = (jnp.dot(f.astype(jnp.bfloat16), w2_ref[l],
                     preferred_element_type=jnp.float32) + b2_ref[l])

        # residual + BatchNorm 2
        h = _batchnorm(h1 + f, g2_ref[l], be2_ref[l])

    out_ref[...] = h.reshape(B, N, E)


# ------------------------------ host wrapper -------------------------------- #

def _pack_params(params, *, num_heads):
    """Host-side weight packing: pad/fuse embed weights, fold Q scale, stack layers,
    cast matmul weights to bf16 (biases / BN affine stay f32)."""
    E = params['node_w'].shape[1]
    node_f = params['node_w'].shape[0]
    depot_f = params['depot_w'].shape[0]
    hd = E // num_heads
    scale = 1.0 / float(hd) ** 0.5

    # zero-pad depot weight along its input dim and fuse with node weight -> (F, 2E)
    dw_pad = jnp.zeros((node_f, E), jnp.float32).at[:depot_f, :].set(params['depot_w'])
    wemb = jnp.concatenate([dw_pad, params['node_w']], axis=1)
    bemb = jnp.concatenate([params['depot_b'], params['node_b']], axis=1)

    stack = lambda k: jnp.stack([lp[k] for lp in params['layers']], axis=0)

    wqkv = stack('wqkv')
    bqkv = stack('bqkv')
    # fold the 1/sqrt(head_dim) attention scale into the Q block of the in-projection
    wqkv = wqkv.at[:, :, :E].multiply(scale)
    bqkv = bqkv.at[:, :, :E].multiply(scale)

    return dict(
        wemb=wemb, bemb=bemb,
        wqkv=wqkv.astype(jnp.bfloat16), bqkv=bqkv,
        wo=stack('wo').astype(jnp.bfloat16), bo=stack('bo'),
        bn1_g=stack('bn1_g'), bn1_b=stack('bn1_b'),
        bn2_g=stack('bn2_g'), bn2_b=stack('bn2_b'),
        ff_w1=stack('ff_w1').astype(jnp.bfloat16), ff_b1=stack('ff_b1'),
        ff_w2=stack('ff_w2').astype(jnp.bfloat16), ff_b2=stack('ff_b2'),
    )


def graph_demand_encoder(x, depot_mask, params, *, num_heads):
    B, N, _ = x.shape
    E = params['node_w'].shape[1]
    L = len(params['layers'])
    pk = _pack_params(params, num_heads=num_heads)
    mask = depot_mask.reshape(B * N, 1).astype(jnp.float32)

    args = (x, mask, pk['wemb'], pk['bemb'],
            pk['wqkv'], pk['bqkv'], pk['wo'], pk['bo'],
            pk['bn1_g'], pk['bn1_b'], pk['bn2_g'], pk['bn2_b'],
            pk['ff_w1'], pk['ff_b1'], pk['ff_w2'], pk['ff_b2'])

    # TODO(synk): for production-size B*N, add a row-tiled grid (row tile a multiple
    # of 8, full E in the lane dim) with a two-pass BatchNorm (global stats reduce,
    # then normalize) and dimension_semantics=('parallel',) so v7x's second
    # TensorCore is used; at demo sizes the whole problem fits one VMEM block.
    return pl.pallas_call(
        functools.partial(encoder_kernel, num_heads=num_heads, num_layers=L),
        out_shape=jax.ShapeDtypeStruct((B, N, E), jnp.float32),
        in_specs=[pl.BlockSpec(memory_space=pltpu.MemorySpace.VMEM) for _ in args],
        out_specs=pl.BlockSpec(memory_space=pltpu.MemorySpace.VMEM),
        compiler_params=pltpu.CompilerParams(
            vmem_limit_bytes=48 * 1024 * 1024),      # stay under v7x's 64 MiB VMEM
    )(*args)


# --------------------------- pure-JAX reference ----------------------------- #

def forward_ref(x, depot_mask, params, *, num_heads):
    B, N, F = x.shape
    E = params['node_w'].shape[1]
    depot_f = params['depot_w'].shape[0]
    x2 = x.reshape(B * N, F)
    de = x2[:, :depot_f] @ params['depot_w'] + params['depot_b']
    ne = x2 @ params['node_w'] + params['node_b']
    m = depot_mask.reshape(B * N, 1).astype(jnp.float32)
    out = jnp.where(m > 0.5, de, ne).reshape(B, N, E)
    hd = E // num_heads

    def bn(h, g, b):
        mu = jnp.mean(h, axis=0, keepdims=True)
        var = jnp.mean((h - mu) ** 2, axis=0, keepdims=True)
        return (h - mu) / jnp.sqrt(var + EPS) * g + b

    for lp in params['layers']:
        x2 = out.reshape(B * N, E)
        qkv = x2 @ lp['wqkv'] + lp['bqkv']
        q, k, v = (qkv[:, i * E:(i + 1) * E].reshape(B, N, num_heads, hd)
                   for i in range(3))
        s = jnp.einsum('bqhd,bkhd->bhqk', q, k) / jnp.sqrt(jnp.float32(hd))
        p = jax.nn.softmax(s, axis=-1)
        o = jnp.einsum('bhqk,bkhd->bqhd', p, v).reshape(B * N, E)
        attn = o @ lp['wo'] + lp['bo']
        h1 = bn(x2 + attn, lp['bn1_g'], lp['bn1_b'])
        f = jnp.maximum(h1 @ lp['ff_w1'] + lp['ff_b1'], 0.0) @ lp['ff_w2'] + lp['ff_b2']
        out = bn(h1 + f, lp['bn2_g'], lp['bn2_b']).reshape(B, N, E)
    return out


# ------------------------------ param init ---------------------------------- #

def init_params(key, *, depot_f, node_f, E, H, num_layers):
    keys = jax.random.split(key, 2 + num_layers)

    def lin(k, shape):
        return jax.random.normal(k, shape, jnp.float32) * 0.1

    params = {
        'depot_w': lin(keys[0], (depot_f, E)),
        'depot_b': jnp.zeros((1, E), jnp.float32),
        'node_w': lin(keys[1], (node_f, E)),
        'node_b': jnp.zeros((1, E), jnp.float32),
        'layers': [],
    }
    for l in range(num_layers):
        ks = jax.random.split(keys[2 + l], 4)
        params['layers'].append({
            'wqkv': lin(ks[0], (E, 3 * E)),
            'bqkv': jnp.zeros((1, 3 * E), jnp.float32),
            'wo': lin(ks[1], (E, E)),
            'bo': jnp.zeros((1, E), jnp.float32),
            'bn1_g': jnp.ones((1, E), jnp.float32),
            'bn1_b': jnp.zeros((1, E), jnp.float32),
            'bn2_g': jnp.ones((1, E), jnp.float32),
            'bn2_b': jnp.zeros((1, E), jnp.float32),
            'ff_w1': lin(ks[2], (E, H)),
            'ff_b1': jnp.zeros((1, H), jnp.float32),
            'ff_w2': lin(ks[3], (H, E)),
            'ff_b2': jnp.zeros((1, E), jnp.float32),
        })
    return params


if __name__ == "__main__":
    B, N = 2, 8
    NODE_F, DEPOT_F = 4, 3
    E, HID = 32, 64
    NUM_HEADS, NUM_LAYERS = 4, 2

    key = jax.random.PRNGKey(0)
    kx, kp = jax.random.split(key)
    x = jax.random.normal(kx, (B, N, NODE_F), jnp.float32)
    # exactly one depot per graph (required by the original PyTorch code to be well-formed)
    depot_mask = jnp.zeros((B, N), jnp.bool_).at[:, 0].set(True)

    params = init_params(kp, depot_f=DEPOT_F, node_f=NODE_F, E=E, H=HID,
                         num_layers=NUM_LAYERS)

    out = graph_demand_encoder(x, depot_mask, params, num_heads=NUM_HEADS)
    out = jax.block_until_ready(out)

    ref = forward_ref(x, depot_mask, params, num_heads=NUM_HEADS)
    assert out.shape == (B, N, E)
    # tolerance covers bf16 matmul operands + approx reciprocal vs the pure-f32 reference
    assert jnp.allclose(out, ref, atol=3e-2, rtol=3e-2), "mismatch vs JAX reference"

    print("KERNEL_OK")
</pallas_src>

<mosaic_0001>
module attributes {stable_mosaic.version = 11 : i64} {
  func.func @encoder_kernel(%arg0: memref<2x8x4xf32, #tpu.memory_space<vmem>>, %arg1: memref<16x1xf32, #tpu.memory_space<vmem>>, %arg2: memref<4x64xf32, #tpu.memory_space<vmem>>, %arg3: memref<1x64xf32, #tpu.memory_space<vmem>>, %arg4: memref<2x32x96xbf16, #tpu.memory_space<vmem>>, %arg5: memref<2x1x96xf32, #tpu.memory_space<vmem>>, %arg6: memref<2x32x32xbf16, #tpu.memory_space<vmem>>, %arg7: memref<2x1x32xf32, #tpu.memory_space<vmem>>, %arg8: memref<2x1x32xf32, #tpu.memory_space<vmem>>, %arg9: memref<2x1x32xf32, #tpu.memory_space<vmem>>, %arg10: memref<2x1x32xf32, #tpu.memory_space<vmem>>, %arg11: memref<2x1x32xf32, #tpu.memory_space<vmem>>, %arg12: memref<2x32x64xbf16, #tpu.memory_space<vmem>>, %arg13: memref<2x1x64xf32, #tpu.memory_space<vmem>>, %arg14: memref<2x64x32xbf16, #tpu.memory_space<vmem>>, %arg15: memref<2x1x32xf32, #tpu.memory_space<vmem>>, %arg16: memref<2x8x32xf32, #tpu.memory_space<vmem>>) attributes {dimension_semantics = [], scalar_prefetch = 0 : i64, scratch_operands = 0 : i64, tpu.core_type = #tpu.core_type<tc>} {
    %c0 = arith.constant 0 : index
    %c0_0 = arith.constant 0 : index
    %c0_1 = arith.constant 0 : index
    %0 = vector.load %arg0[%c0, %c0_0, %c0_1] : memref<2x8x4xf32, #tpu.memory_space<vmem>>, vector<2x8x4xf32>
    %1 = vector.shape_cast %0 : vector<2x8x4xf32> to vector<16x4xf32>
    %c0_2 = arith.constant 0 : index
    %c0_3 = arith.constant 0 : index
    %2 = vector.load %arg2[%c0_2, %c0_3] : memref<4x64xf32, #tpu.memory_space<vmem>>, vector<4x64xf32>
    %cst = arith.constant dense<0.000000e+00> : vector<16x64xf32>
    %3 = tpu.matmul %1, %2, %cst {dimension_numbers = #tpu.dot_dimension_numbers<[1], [0], [0], [1], [0, 0, 1, 1], [], []>} : vector<16x4xf32>, vector<4x64xf32>, vector<16x64xf32> -> vector<16x64xf32>
    %c0_4 = arith.constant 0 : index
    %c0_5 = arith.constant 0 : index
    %4 = vector.load %arg3[%c0_4, %c0_5] : memref<1x64xf32, #tpu.memory_space<vmem>>, vector<1x64xf32>
    %5 = vector.broadcast %4 : vector<1x64xf32> to vector<16x64xf32>
    %6 = arith.addf %3, %5 : vector<16x64xf32>
    %c0_6 = arith.constant 0 : index
    %c0_7 = arith.constant 0 : index
    %7 = vector.load %arg1[%c0_6, %c0_7] : memref<16x1xf32, #tpu.memory_space<vmem>>, vector<16x1xf32>
    %cst_8 = arith.constant 5.000000e-01 : f32
    %8 = vector.broadcast %cst_8 : f32 to vector<16x1xf32>
    %9 = arith.cmpf ogt, %7, %8 : vector<16x1xf32>
    %10 = vector.extract_strided_slice %6 {offsets = [0, 0], sizes = [16, 32], strides = [1, 1]} : vector<16x64xf32> to vector<16x32xf32>
    %11 = vector.extract_strided_slice %6 {offsets = [0, 32], sizes = [16, 32], strides = [1, 1]} : vector<16x64xf32> to vector<16x32xf32>
    %12 = vector.shape_cast %9 : vector<16x1xi1> to vector<16x1xi1>
    %13 = vector.broadcast %12 : vector<16x1xi1> to vector<16x32xi1>
    %14 = arith.select %13, %10, %11 : vector<16x32xi1>, vector<16x32xf32>
    %15 = arith.truncf %14 : vector<16x32xf32> to vector<16x32xbf16>
    %c0_9 = arith.constant 0 : index
    %c0_10 = arith.constant 0 : index
    %c0_11 = arith.constant 0 : index
    %16 = vector.load %arg4[%c0_9, %c0_10, %c0_11] : memref<2x32x96xbf16, #tpu.memory_space<vmem>>, vector<1x32x96xbf16>
    %17 = vector.shape_cast %16 : vector<1x32x96xbf16> to vector<32x96xbf16>
    %cst_12 = arith.constant dense<0.000000e+00> : vector<16x96xf32>
    %18 = tpu.matmul %15, %17, %cst_12 {dimension_numbers = #tpu.dot_dimension_numbers<[1], [0], [0], [1], [0, 0, 1, 1], [], []>} : vector<16x32xbf16>, vector<32x96xbf16>, vector<16x96xf32> -> vector<16x96xf32>
    %c0_13 = arith.constant 0 : index
    %c0_14 = arith.constant 0 : index
    %c0_15 = arith.constant 0 : index
    %19 = vector.load %arg5[%c0_13, %c0_14, %c0_15] : memref<2x1x96xf32, #tpu.memory_space<vmem>>, vector<1x1x96xf32>
    %20 = vector.shape_cast %19 : vector<1x1x96xf32> to vector<1x96xf32>
    %21 = vector.broadcast %20 : vector<1x96xf32> to vector<16x96xf32>
    %22 = arith.addf %18, %21 : vector<16x96xf32>
    %23 = vector.extract_strided_slice %22 {offsets = [0, 0], sizes = [16, 8], strides = [1, 1]} : vector<16x96xf32> to vector<16x8xf32>
    %24 = vector.shape_cast %23 : vector<16x8xf32> to vector<2x8x8xf32>
    %25 = vector.extract_strided_slice %22 {offsets = [0, 32], sizes = [16, 8], strides = [1, 1]} : vector<16x96xf32> to vector<16x8xf32>
    %26 = vector.shape_cast %25 : vector<16x8xf32> to vector<2x8x8xf32>
    %27 = vector.extract_strided_slice %22 {offsets = [0, 64], sizes = [16, 8], strides = [1, 1]} : vector<16x96xf32> to vector<16x8xf32>
    %28 = vector.shape_cast %27 : vector<16x8xf32> to vector<2x8x8xf32>
    "tpu.trace_start"() <{level = 10 : i32, message = "bqd,bkd->bqk"}> : () -> ()
    %cst_16 = arith.constant dense<0.000000e+00> : vector<2x8x8xf32>
    %29 = tpu.matmul %24, %26, %cst_16 {dimension_numbers = #tpu.dot_dimension_numbers<[2], [2], [1], [1], [0, 0, 0, 1, 1, 1], [0], [0]>} : vector<2x8x8xf32>, vector<2x8x8xf32>, vector<2x8x8xf32> -> vector<2x8x8xf32>
    "tpu.trace_stop"() : () -> ()
    %cst_17 = arith.constant dense<0xFF800000> : vector<2x8xf32>
    %30 = vector.multi_reduction <maximumf>, %29, %cst_17 [2] : vector<2x8x8xf32> to vector<2x8xf32>
    %31 = vector.shape_cast %30 : vector<2x8xf32> to vector<2x8x1xf32>
    %32 = vector.broadcast %31 : vector<2x8x1xf32> to vector<2x8x8xf32>
    %33 = arith.subf %29, %32 : vector<2x8x8xf32>
    %34 = math.exp %33 : vector<2x8x8xf32>
    %cst_18 = arith.constant dense<0.000000e+00> : vector<2x8xf32>
    %35 = vector.multi_reduction <add>, %34, %cst_18 [2] : vector<2x8x8xf32> to vector<2x8xf32>
    %36 = vector.shape_cast %35 : vector<2x8xf32> to vector<2x8x1xf32>
    %37 = tpu.reciprocal %36 {approx = true} : vector<2x8x1xf32> -> vector<2x8x1xf32>
    %38 = vector.broadcast %37 : vector<2x8x1xf32> to vector<2x8x8xf32>
    %39 = arith.mulf %34, %38 : vector<2x8x8xf32>
    "tpu.trace_start"() <{level = 10 : i32, message = "bqk,bkd->bqd"}> : () -> ()
    %cst_19 = arith.constant dense<0.000000e+00> : vector<2x8x8xf32>
    %40 = tpu.matmul %39, %28, %cst_19 {dimension_numbers = #tpu.dot_dimension_numbers<[2], [1], [1], [2], [0, 0, 0, 1, 1, 2], [0], [0]>} : vector<2x8x8xf32>, vector<2x8x8xf32>, vector<2x8x8xf32> -> vector<2x8x8xf32>
    "tpu.trace_stop"() : () -> ()
    %41 = vector.extract_strided_slice %22 {offsets = [0, 8], sizes = [16, 8], strides = [1, 1]} : vector<16x96xf32> to vector<16x8xf32>
    %42 = vector.shape_cast %41 : vector<16x8xf32> to vector<2x8x8xf32>
    %43 = vector.extract_strided_slice %22 {offsets = [0, 40], sizes = [16, 8], strides = [1, 1]} : vector<16x96xf32> to vector<16x8xf32>
    %44 = vector.shape_cast %43 : vector<16x8xf32> to vector<2x8x8xf32>
    %45 = vector.extract_strided_slice %22 {offsets = [0, 72], sizes = [16, 8], strides = [1, 1]} : vector<16x96xf32> to vector<16x8xf32>
    %46 = vector.shape_cast %45 : vector<16x8xf32> to vector<2x8x8xf32>
    "tpu.trace_start"() <{level = 10 : i32, message = "bqd,bkd->bqk"}> : () -> ()
    %cst_20 = arith.constant dense<0.000000e+00> : vector<2x8x8xf32>
    %47 = tpu.matmul %42, %44, %cst_20 {dimension_numbers = #tpu.dot_dimension_numbers<[2], [2], [1], [1], [0, 0, 0, 1, 1, 1], [0], [0]>} : vector<2x8x8xf32>, vector<2x8x8xf32>, vector<2x8x8xf32> -> vector<2x8x8xf32>
    "tpu.trace_stop"() : () -> ()
    %cst_21 = arith.constant dense<0xFF800000> : vector<2x8xf32>
    %48 = vector.multi_reduction <maximumf>, %47, %cst_21 [2] : vector<2x8x8xf32> to vector<2x8xf32>
    %49 = vector.shape_cast %48 : vector<2x8xf32> to vector<2x8x1xf32>
    %50 = vector.broadcast %49 : vector<2x8x1xf32> to vector<2x8x8xf32>
    %51 = arith.subf %47, %50 : vector<2x8x8xf32>
    %52 = math.exp %51 : vector<2x8x8xf32>
    %cst_22 = arith.constant dense<0.000000e+00> : vector<2x8xf32>
    %53 = vector.multi_reduction <add>, %52, %cst_22 [2] : vector<2x8x8xf32> to vector<2x8xf32>
    %54 = vector.shape_cast %53 : vector<2x8xf32> to vector<2x8x1xf32>
    %55 = tpu.reciprocal %54 {approx = true} : vector<2x8x1xf32> -> vector<2x8x1xf32>
    %56 = vector.broadcast %55 : vector<2x8x1xf32> to vector<2x8x8xf32>
    %57 = arith.mulf %52, %56 : vector<2x8x8xf32>
    "tpu.trace_start"() <{level = 10 : i32, message = "bqk,bkd->bqd"}> : () -> ()
    %cst_23 = arith.constant dense<0.000000e+00> : vector<2x8x8xf32>
    %58 = tpu.matmul %57, %46, %cst_23 {dimension_numbers = #tpu.dot_dimension_numbers<[2], [1], [1], [2], [0, 0, 0, 1, 1, 2], [0], [0]>} : vector<2x8x8xf32>, vector<2x8x8xf32>, vector<2x8x8xf32> -> vector<2x8x8xf32>
    "tpu.trace_stop"() : () -> ()
    %59 = vector.extract_strided_slice %22 {offsets = [0, 16], sizes = [16, 8], strides = [1, 1]} : vector<16x96xf32> to vector<16x8xf32>
    %60 = vector.shape_cast %59 : vector<16x8xf32> to vector<2x8x8xf32>
    %61 = vector.extract_strided_slice %22 {offsets = [0, 48], sizes = [16, 8], strides = [1, 1]} : vector<16x96xf32> to vector<16x8xf32>
    %62 = vector.shape_cast %61 : vector<16x8xf32> to vector<2x8x8xf32>
    %63 = vector.extract_strided_slice %22 {offsets = [0, 80], sizes = [16, 8], strides = [1, 1]} : vector<16x96xf32> to vector<16x8xf32>
    %64 = vector.shape_cast %63 : vector<16x8xf32> to vector<2x8x8xf32>
    "tpu.trace_start"() <{level = 10 : i32, message = "bqd,bkd->bqk"}> : () -> ()
    %cst_24 = arith.constant dense<0.000000e+00> : vector<2x8x8xf32>
    %65 = tpu.matmul %60, %62, %cst_24 {dimension_numbers = #tpu.dot_dimension_numbers<[2], [2], [1], [1], [0, 0, 0, 1, 1, 1], [0], [0]>} : vector<2x8x8xf32>, vector<2x8x8xf32>, vector<2x8x8xf32> -> vector<2x8x8xf32>
    "tpu.trace_stop"() : () -> ()
    %cst_25 = arith.constant dense<0xFF800000> : vector<2x8xf32>
    %66 = vector.multi_reduction <maximumf>, %65, %cst_25 [2] : vector<2x8x8xf32> to vector<2x8xf32>
    %67 = vector.shape_cast %66 : vector<2x8xf32> to vector<2x8x1xf32>
    %68 = vector.broadcast %67 : vector<2x8x1xf32> to vector<2x8x8xf32>
    %69 = arith.subf %65, %68 : vector<2x8x8xf32>
    %70 = math.exp %69 : vector<2x8x8xf32>
    %cst_26 = arith.constant dense<0.000000e+00> : vector<2x8xf32>
    %71 = vector.multi_reduction <add>, %70, %cst_26 [2] : vector<2x8x8xf32> to vector<2x8xf32>
    %72 = vector.shape_cast %71 : vector<2x8xf32> to vector<2x8x1xf32>
    %73 = tpu.reciprocal %72 {approx = true} : vector<2x8x1xf32> -> vector<2x8x1xf32>
    %74 = vector.broadcast %73 : vector<2x8x1xf32> to vector<2x8x8xf32>
    %75 = arith.mulf %70, %74 : vector<2x8x8xf32>
    "tpu.trace_start"() <{level = 10 : i32, message = "bqk,bkd->bqd"}> : () -> ()
    %cst_27 = arith.constant dense<0.000000e+00> : vector<2x8x8xf32>
    %76 = tpu.matmul %75, %64, %cst_27 {dimension_numbers = #tpu.dot_dimension_numbers<[2], [1], [1], [2], [0, 0, 0, 1, 1, 2], [0], [0]>} : vector<2x8x8xf32>, vector<2x8x8xf32>, vector<2x8x8xf32> -> vector<2x8x8xf32>
    "tpu.trace_stop"() : () -> ()
    %77 = vector.extract_strided_slice %22 {offsets = [0, 24], sizes = [16, 8], strides = [1, 1]} : vector<16x96xf32> to vector<16x8xf32>
    %78 = vector.shape_cast %77 : vector<16x8xf32> to vector<2x8x8xf32>
    %79 = vector.extract_strided_slice %22 {offsets = [0, 56], sizes = [16, 8], strides = [1, 1]} : vector<16x96xf32> to vector<16x8xf32>
    %80 = vector.shape_cast %79 : vector<16x8xf32> to vector<2x8x8xf32>
    %81 = vector.extract_strided_slice %22 {offsets = [0, 88], sizes = [16, 8], strides = [1, 1]} : vector<16x96xf32> to vector<16x8xf32>
    %82 = vector.shape_cast %81 : vector<16x8xf32> to vector<2x8x8xf32>
    "tpu.trace_start"() <{level = 10 : i32, message = "bqd,bkd->bqk"}> : () -> ()
    %cst_28 = arith.constant dense<0.000000e+00> : vector<2x8x8xf32>
    %83 = tpu.matmul %78, %80, %cst_28 {dimension_numbers = #tpu.dot_dimension_numbers<[2], [2], [1], [1], [0, 0, 0, 1, 1, 1], [0], [0]>} : vector<2x8x8xf32>, vector<2x8x8xf32>, vector<2x8x8xf32> -> vector<2x8x8xf32>
    "tpu.trace_stop"() : () -> ()
    %cst_29 = arith.constant dense<0xFF800000> : vector<2x8xf32>
    %84 = vector.multi_reduction <maximumf>, %83, %cst_29 [2] : vector<2x8x8xf32> to vector<2x8xf32>
    %85 = vector.shape_cast %84 : vector<2x8xf32> to vector<2x8x1xf32>
    %86 = vector.broadcast %85 : vector<2x8x1xf32> to vector<2x8x8xf32>
    %87 = arith.subf %83, %86 : vector<2x8x8xf32>
    %88 = math.exp %87 : vector<2x8x8xf32>
    %cst_30 = arith.constant dense<0.000000e+00> : vector<2x8xf32>
    %89 = vector.multi_reduction <add>, %88, %cst_30 [2] : vector<2x8x8xf32> to vector<2x8xf32>
    %90 = vector.shape_cast %89 : vector<2x8xf32> to vector<2x8x1xf32>
    %91 = tpu.reciprocal %90 {approx = true} : vector<2x8x1xf32> -> vector<2x8x1xf32>
    %92 = vector.broadcast %91 : vector<2x8x1xf32> to vector<2x8x8xf32>
    %93 = arith.mulf %88, %92 : vector<2x8x8xf32>
    "tpu.trace_start"() <{level = 10 : i32, message = "bqk,bkd->bqd"}> : () -> ()
    %cst_31 = arith.constant dense<0.000000e+00> : vector<2x8x8xf32>
    %94 = tpu.matmul %93, %82, %cst_31 {dimension_numbers = #tpu.dot_dimension_numbers<[2], [1], [1], [2], [0, 0, 0, 1, 1, 2], [0], [0]>} : vector<2x8x8xf32>, vector<2x8x8xf32>, vector<2x8x8xf32> -> vector<2x8x8xf32>
    "tpu.trace_stop"() : () -> ()
    %95 = tpu.concatenate %40, %58, %76, %94 in 2 : vector<2x8x8xf32>, vector<2x8x8xf32>, vector<2x8x8xf32>, vector<2x8x8xf32> -> vector<2x8x32xf32>
    %96 = vector.shape_cast %95 : vector<2x8x32xf32> to vector<16x32xf32>
    %97 = arith.truncf %96 : vector<16x32xf32> to vector<16x32xbf16>
    %c0_32 = arith.constant 0 : index
    %c0_33 = arith.constant 0 : index
    %c0_34 = arith.constant 0 : index
    %98 = vector.load %arg6[%c0_32, %c0_33, %c0_34] : memref<2x32x32xbf16, #tpu.memory_space<vmem>>, vector<1x32x32xbf16>
    %99 = vector.shape_cast %98 : vector<1x32x32xbf16> to vector<32x32xbf16>
    %cst_35 = arith.constant dense<0.000000e+00> : vector<16x32xf32>
    %100 = tpu.matmul %97, %99, %cst_35 {dimension_numbers = #tpu.dot_dimension_numbers<[1], [0], [0], [1], [0, 0, 1, 1], [], []>} : vector<16x32xbf16>, vector<32x32xbf16>, vector<16x32xf32> -> vector<16x32xf32>
    %c0_36 = arith.constant 0 : index
    %c0_37 = arith.constant 0 : index
    %c0_38 = arith.constant 0 : index
    %101 = vector.load %arg7[%c0_36, %c0_37, %c0_38] : memref<2x1x32xf32, #tpu.memory_space<vmem>>, vector<1x1x32xf32>
    %102 = vector.shape_cast %101 : vector<1x1x32xf32> to vector<1x32xf32>
    %103 = vector.broadcast %102 : vector<1x32xf32> to vector<16x32xf32>
    %104 = arith.addf %100, %103 : vector<16x32xf32>
    %105 = arith.addf %14, %104 : vector<16x32xf32>
    %c0_39 = arith.constant 0 : index
    %c0_40 = arith.constant 0 : index
    %c0_41 = arith.constant 0 : index
    %106 = vector.load %arg8[%c0_39, %c0_40, %c0_41] : memref<2x1x32xf32, #tpu.memory_space<vmem>>, vector<1x1x32xf32>
    %107 = vector.shape_cast %106 : vector<1x1x32xf32> to vector<1x32xf32>
    %c0_42 = arith.constant 0 : index
    %c0_43 = arith.constant 0 : index
    %c0_44 = arith.constant 0 : index
    %108 = vector.load %arg9[%c0_42, %c0_43, %c0_44] : memref<2x1x32xf32, #tpu.memory_space<vmem>>, vector<1x1x32xf32>
    %109 = vector.shape_cast %108 : vector<1x1x32xf32> to vector<1x32xf32>
    %cst_45 = arith.constant dense<0.000000e+00> : vector<32xf32>
    %110 = vector.multi_reduction <add>, %105, %cst_45 [0] : vector<16x32xf32> to vector<32xf32>
    %111 = vector.shape_cast %110 : vector<32xf32> to vector<1x32xf32>
    %cst_46 = arith.constant 6.250000e-02 : f32
    %112 = vector.broadcast %cst_46 : f32 to vector<1x32xf32>
    %113 = arith.mulf %111, %112 : vector<1x32xf32>
    %114 = arith.mulf %105, %105 : vector<16x32xf32>
    %cst_47 = arith.constant dense<0.000000e+00> : vector<32xf32>
    %115 = vector.multi_reduction <add>, %114, %cst_47 [0] : vector<16x32xf32> to vector<32xf32>
    %116 = vector.shape_cast %115 : vector<32xf32> to vector<1x32xf32>
    %cst_48 = arith.constant 6.250000e-02 : f32
    %117 = vector.broadcast %cst_48 : f32 to vector<1x32xf32>
    %118 = arith.mulf %116, %117 : vector<1x32xf32>
    %119 = arith.mulf %113, %113 : vector<1x32xf32>
    %120 = arith.subf %118, %119 : vector<1x32xf32>
    %cst_49 = arith.constant 9.99999974E-6 : f32
    %121 = vector.broadcast %cst_49 : f32 to vector<1x32xf32>
    %122 = arith.addf %120, %121 : vector<1x32xf32>
    %123 = math.rsqrt %122 : vector<1x32xf32>
    %124 = arith.mulf %123, %107 : vector<1x32xf32>
    %125 = vector.broadcast %113 : vector<1x32xf32> to vector<16x32xf32>
    %126 = arith.subf %105, %125 : vector<16x32xf32>
    %127 = vector.broadcast %124 : vector<1x32xf32> to vector<16x32xf32>
    %128 = arith.mulf %126, %127 : vector<16x32xf32>
    %129 = vector.broadcast %109 : vector<1x32xf32> to vector<16x32xf32>
    %130 = arith.addf %128, %129 : vector<16x32xf32>
    %131 = arith.truncf %130 : vector<16x32xf32> to vector<16x32xbf16>
    %c0_50 = arith.constant 0 : index
    %c0_51 = arith.constant 0 : index
    %c0_52 = arith.constant 0 : index
    %132 = vector.load %arg12[%c0_50, %c0_51, %c0_52] : memref<2x32x64xbf16, #tpu.memory_space<vmem>>, vector<1x32x64xbf16>
    %133 = vector.shape_cast %132 : vector<1x32x64xbf16> to vector<32x64xbf16>
    %cst_53 = arith.constant dense<0.000000e+00> : vector<16x64xf32>
    %134 = tpu.matmul %131, %133, %cst_53 {dimension_numbers = #tpu.dot_dimension_numbers<[1], [0], [0], [1], [0, 0, 1, 1], [], []>} : vector<16x32xbf16>, vector<32x64xbf16>, vector<16x64xf32> -> vector<16x64xf32>
    %c0_54 = arith.constant 0 : index
    %c0_55 = arith.constant 0 : index
    %c0_56 = arith.constant 0 : index
    %135 = vector.load %arg13[%c0_54, %c0_55, %c0_56] : memref<2x1x64xf32, #tpu.memory_space<vmem>>, vector<1x1x64xf32>
    %136 = vector.shape_cast %135 : vector<1x1x64xf32> to vector<1x64xf32>
    %137 = vector.broadcast %136 : vector<1x64xf32> to vector<16x64xf32>
    %138 = arith.addf %134, %137 : vector<16x64xf32>
    %cst_57 = arith.constant 0.000000e+00 : f32
    %139 = vector.broadcast %cst_57 : f32 to vector<16x64xf32>
    %140 = arith.maximumf %138, %139 : vector<16x64xf32>
    %141 = arith.truncf %140 : vector<16x64xf32> to vector<16x64xbf16>
    %c0_58 = arith.constant 0 : index
    %c0_59 = arith.constant 0 : index
    %c0_60 = arith.constant 0 : index
    %142 = vector.load %arg14[%c0_58, %c0_59, %c0_60] : memref<2x64x32xbf16, #tpu.memory_space<vmem>>, vector<1x64x32xbf16>
    %143 = vector.shape_cast %142 : vector<1x64x32xbf16> to vector<64x32xbf16>
    %cst_61 = arith.constant dense<0.000000e+00> : vector<16x32xf32>
    %144 = tpu.matmul %141, %143, %cst_61 {dimension_numbers = #tpu.dot_dimension_numbers<[1], [0], [0], [1], [0, 0, 1, 1], [], []>} : vector<16x64xbf16>, vector<64x32xbf16>, vector<16x32xf32> -> vector<16x32xf32>
    %c0_62 = arith.constant 0 : index
    %c0_63 = arith.constant 0 : index
    %c0_64 = arith.constant 0 : index
    %145 = vector.load %arg15[%c0_62, %c0_63, %c0_64] : memref<2x1x32xf32, #tpu.memory_space<vmem>>, vector<1x1x32xf32>
    %146 = vector.shape_cast %145 : vector<1x1x32xf32> to vector<1x32xf32>
    %147 = vector.broadcast %146 : vector<1x32xf32> to vector<16x32xf32>
    %148 = arith.addf %144, %147 : vector<16x32xf32>
    %149 = arith.addf %130, %148 : vector<16x32xf32>
    %c0_65 = arith.constant 0 : index
    %c0_66 = arith.constant 0 : index
    %c0_67 = arith.constant 0 : index
    %150 = vector.load %arg10[%c0_65, %c0_66, %c0_67] : memref<2x1x32xf32, #tpu.memory_space<vmem>>, vector<1x1x32xf32>
    %151 = vector.shape_cast %150 : vector<1x1x32xf32> to vector<1x32xf32>
    %c0_68 = arith.constant 0 : index
    %c0_69 = arith.constant 0 : index
    %c0_70 = arith.constant 0 : index
    %152 = vector.load %arg11[%c0_68, %c0_69, %c0_70] : memref<2x1x32xf32, #tpu.memory_space<vmem>>, vector<1x1x32xf32>
    %153 = vector.shape_cast %152 : vector<1x1x32xf32> to vector<1x32xf32>
    %cst_71 = arith.constant dense<0.000000e+00> : vector<32xf32>
    %154 = vector.multi_reduction <add>, %149, %cst_71 [0] : vector<16x32xf32> to vector<32xf32>
    %155 = vector.shape_cast %154 : vector<32xf32> to vector<1x32xf32>
    %cst_72 = arith.constant 6.250000e-02 : f32
    %156 = vector.broadcast %cst_72 : f32 to vector<1x32xf32>
    %157 = arith.mulf %155, %156 : vector<1x32xf32>
    %158 = arith.mulf %149, %149 : vector<16x32xf32>
    %cst_73 = arith.constant dense<0.000000e+00> : vector<32xf32>
    %159 = vector.multi_reduction <add>, %158, %cst_73 [0] : vector<16x32xf32> to vector<32xf32>
    %160 = vector.shape_cast %159 : vector<32xf32> to vector<1x32xf32>
    %cst_74 = arith.constant 6.250000e-02 : f32
    %161 = vector.broadcast %cst_74 : f32 to vector<1x32xf32>
    %162 = arith.mulf %160, %161 : vector<1x32xf32>
    %163 = arith.mulf %157, %157 : vector<1x32xf32>
    %164 = arith.subf %162, %163 : vector<1x32xf32>
    %cst_75 = arith.constant 9.99999974E-6 : f32
    %165 = vector.broadcast %cst_75 : f32 to vector<1x32xf32>
    %166 = arith.addf %164, %165 : vector<1x32xf32>
    %167 = math.rsqrt %166 : vector<1x32xf32>
    %168 = arith.mulf %167, %151 : vector<1x32xf32>
    %169 = vector.broadcast %157 : vector<1x32xf32> to vector<16x32xf32>
    %170 = arith.subf %149, %169 : vector<16x32xf32>
    %171 = vector.broadcast %168 : vector<1x32xf32> to vector<16x32xf32>
    %172 = arith.mulf %170, %171 : vector<16x32xf32>
    %173 = vector.broadcast %153 : vector<1x32xf32> to vector<16x32xf32>
    %174 = arith.addf %172, %173 : vector<16x32xf32>
    %175 = arith.truncf %174 : vector<16x32xf32> to vector<16x32xbf16>
    %c1 = arith.constant 1 : index
    %c0_76 = arith.constant 0 : index
    %c0_77 = arith.constant 0 : index
    %176 = vector.load %arg4[%c1, %c0_76, %c0_77] : memref<2x32x96xbf16, #tpu.memory_space<vmem>>, vector<1x32x96xbf16>
    %177 = vector.shape_cast %176 : vector<1x32x96xbf16> to vector<32x96xbf16>
    %cst_78 = arith.constant dense<0.000000e+00> : vector<16x96xf32>
    %178 = tpu.matmul %175, %177, %cst_78 {dimension_numbers = #tpu.dot_dimension_numbers<[1], [0], [0], [1], [0, 0, 1, 1], [], []>} : vector<16x32xbf16>, vector<32x96xbf16>, vector<16x96xf32> -> vector<16x96xf32>
    %c1_79 = arith.constant 1 : index
    %c0_80 = arith.constant 0 : index
    %c0_81 = arith.constant 0 : index
    %179 = vector.load %arg5[%c1_79, %c0_80, %c0_81] : memref<2x1x96xf32, #tpu.memory_space<vmem>>, vector<1x1x96xf32>
    %180 = vector.shape_cast %179 : vector<1x1x96xf32> to vector<1x96xf32>
    %181 = vector.broadcast %180 : vector<1x96xf32> to vector<16x96xf32>
    %182 = arith.addf %178, %181 : vector<16x96xf32>
    %183 = vector.extract_strided_slice %182 {offsets = [0, 0], sizes = [16, 8], strides = [1, 1]} : vector<16x96xf32> to vector<16x8xf32>
    %184 = vector.shape_cast %183 : vector<16x8xf32> to vector<2x8x8xf32>
    %185 = vector.extract_strided_slice %182 {offsets = [0, 32], sizes = [16, 8], strides = [1, 1]} : vector<16x96xf32> to vector<16x8xf32>
    %186 = vector.shape_cast %185 : vector<16x8xf32> to vector<2x8x8xf32>
    %187 = vector.extract_strided_slice %182 {offsets = [0, 64], sizes = [16, 8], strides = [1, 1]} : vector<16x96xf32> to vector<16x8xf32>
    %188 = vector.shape_cast %187 : vector<16x8xf32> to vector<2x8x8xf32>
    "tpu.trace_start"() <{level = 10 : i32, message = "bqd,bkd->bqk"}> : () -> ()
    %cst_82 = arith.constant dense<0.000000e+00> : vector<2x8x8xf32>
    %189 = tpu.matmul %184, %186, %cst_82 {dimension_numbers = #tpu.dot_dimension_numbers<[2], [2], [1], [1], [0, 0, 0, 1, 1, 1], [0], [0]>} : vector<2x8x8xf32>, vector<2x8x8xf32>, vector<2x8x8xf32> -> vector<2x8x8xf32>
    "tpu.trace_stop"() : () -> ()
    %cst_83 = arith.constant dense<0xFF800000> : vector<2x8xf32>
    %190 = vector.multi_reduction <maximumf>, %189, %cst_83 [2] : vector<2x8x8xf32> to vector<2x8xf32>
    %191 = vector.shape_cast %190 : vector<2x8xf32> to vector<2x8x1xf32>
    %192 = vector.broadcast %191 : vector<2x8x1xf32> to vector<2x8x8xf32>
    %193 = arith.subf %189, %192 : vector<2x8x8xf32>
    %194 = math.exp %193 : vector<2x8x8xf32>
    %cst_84 = arith.constant dense<0.000000e+00> : vector<2x8xf32>
    %195 = vector.multi_reduction <add>, %194, %cst_84 [2] : vector<2x8x8xf32> to vector<2x8xf32>
    %196 = vector.shape_cast %195 : vector<2x8xf32> to vector<2x8x1xf32>
    %197 = tpu.reciprocal %196 {approx = true} : vector<2x8x1xf32> -> vector<2x8x1xf32>
    %198 = vector.broadcast %197 : vector<2x8x1xf32> to vector<2x8x8xf32>
    %199 = arith.mulf %194, %198 : vector<2x8x8xf32>
    "tpu.trace_start"() <{level = 10 : i32, message = "bqk,bkd->bqd"}> : () -> ()
    %cst_85 = arith.constant dense<0.000000e+00> : vector<2x8x8xf32>
    %200 = tpu.matmul %199, %188, %cst_85 {dimension_numbers = #tpu.dot_dimension_numbers<[2], [1], [1], [2], [0, 0, 0, 1, 1, 2], [0], [0]>} : vector<2x8x8xf32>, vector<2x8x8xf32>, vector<2x8x8xf32> -> vector<2x8x8xf32>
    "tpu.trace_stop"() : () -> ()
    %201 = vector.extract_strided_slice %182 {offsets = [0, 8], sizes = [16, 8], strides = [1, 1]} : vector<16x96xf32> to vector<16x8xf32>
    %202 = vector.shape_cast %201 : vector<16x8xf32> to vector<2x8x8xf32>
    %203 = vector.extract_strided_slice %182 {offsets = [0, 40], sizes = [16, 8], strides = [1, 1]} : vector<16x96xf32> to vector<16x8xf32>
    %204 = vector.shape_cast %203 : vector<16x8xf32> to vector<2x8x8xf32>
    %205 = vector.extract_strided_slice %182 {offsets = [0, 72], sizes = [16, 8], strides = [1, 1]} : vector<16x96xf32> to vector<16x8xf32>
    %206 = vector.shape_cast %205 : vector<16x8xf32> to vector<2x8x8xf32>
    "tpu.trace_start"() <{level = 10 : i32, message = "bqd,bkd->bqk"}> : () -> ()
    %cst_86 = arith.constant dense<0.000000e+00> : vector<2x8x8xf32>
    %207 = tpu.matmul %202, %204, %cst_86 {dimension_numbers = #tpu.dot_dimension_numbers<[2], [2], [1], [1], [0, 0, 0, 1, 1, 1], [0], [0]>} : vector<2x8x8xf32>, vector<2x8x8xf32>, vector<2x8x8xf32> -> vector<2x8x8xf32>
    "tpu.trace_stop"() : () -> ()
    %cst_87 = arith.constant dense<0xFF800000> : vector<2x8xf32>
    %208 = vector.multi_reduction <maximumf>, %207, %cst_87 [2] : vector<2x8x8xf32> to vector<2x8xf32>
    %209 = vector.shape_cast %208 : vector<2x8xf32> to vector<2x8x1xf32>
    %210 = vector.broadcast %209 : vector<2x8x1xf32> to vector<2x8x8xf32>
    %211 = arith.subf %207, %210 : vector<2x8x8xf32>
    %212 = math.exp %211 : vector<2x8x8xf32>
    %cst_88 = arith.constant dense<0.000000e+00> : vector<2x8xf32>
    %213 = vector.multi_reduction <add>, %212, %cst_88 [2] : vector<2x8x8xf32> to vector<2x8xf32>
    %214 = vector.shape_cast %213 : vector<2x8xf32> to vector<2x8x1xf32>
    %215 = tpu.reciprocal %214 {approx = true} : vector<2x8x1xf32> -> vector<2x8x1xf32>
    %216 = vector.broadcast %215 : vector<2x8x1xf32> to vector<2x8x8xf32>
    %217 = arith.mulf %212, %216 : vector<2x8x8xf32>
    "tpu.trace_start"() <{level = 10 : i32, message = "bqk,bkd->bqd"}> : () -> ()
    %cst_89 = arith.constant dense<0.000000e+00> : vector<2x8x8xf32>
    %218 = tpu.matmul %217, %206, %cst_89 {dimension_numbers = #tpu.dot_dimension_numbers<[2], [1], [1], [2], [0, 0, 0, 1, 1, 2], [0], [0]>} : vector<2x8x8xf32>, vector<2x8x8xf32>, vector<2x8x8xf32> -> vector<2x8x8xf32>
    "tpu.trace_stop"() : () -> ()
    %219 = vector.extract_strided_slice %182 {offsets = [0, 16], sizes = [16, 8], strides = [1, 1]} : vector<16x96xf32> to vector<16x8xf32>
    %220 = vector.shape_cast %219 : vector<16x8xf32> to vector<2x8x8xf32>
    %221 = vector.extract_strided_slice %182 {offsets = [0, 48], sizes = [16, 8], strides = [1, 1]} : vector<16x96xf32> to vector<16x8xf32>
    %222 = vector.shape_cast %221 : vector<16x8xf32> to vector<2x8x8xf32>
    %223 = vector.extract_strided_slice %182 {offsets = [0, 80], sizes = [16, 8], strides = [1, 1]} : vector<16x96xf32> to vector<16x8xf32>
    %224 = vector.shape_cast %223 : vector<16x8xf32> to vector<2x8x8xf32>
    "tpu.trace_start"() <{level = 10 : i32, message = "bqd,bkd->bqk"}> : () -> ()
    %cst_90 = arith.constant dense<0.000000e+00> : vector<2x8x8xf32>
    %225 = tpu.matmul %220, %222, %cst_90 {dimension_numbers = #tpu.dot_dimension_numbers<[2], [2], [1], [1], [0, 0, 0, 1, 1, 1], [0], [0]>} : vector<2x8x8xf32>, vector<2x8x8xf32>, vector<2x8x8xf32> -> vector<2x8x8xf32>
    "tpu.trace_stop"() : () -> ()
    %cst_91 = arith.constant dense<0xFF800000> : vector<2x8xf32>
    %226 = vector.multi_reduction <maximumf>, %225, %cst_91 [2] : vector<2x8x8xf32> to vector<2x8xf32>
    %227 = vector.shape_cast %226 : vector<2x8xf32> to vector<2x8x1xf32>
    %228 = vector.broadcast %227 : vector<2x8x1xf32> to vector<2x8x8xf32>
    %229 = arith.subf %225, %228 : vector<2x8x8xf32>
    %230 = math.exp %229 : vector<2x8x8xf32>
    %cst_92 = arith.constant dense<0.000000e+00> : vector<2x8xf32>
    %231 = vector.multi_reduction <add>, %230, %cst_92 [2] : vector<2x8x8xf32> to vector<2x8xf32>
    %232 = vector.shape_cast %231 : vector<2x8xf32> to vector<2x8x1xf32>
    %233 = tpu.reciprocal %232 {approx = true} : vector<2x8x1xf32> -> vector<2x8x1xf32>
    %234 = vector.broadcast %233 : vector<2x8x1xf32> to vector<2x8x8xf32>
    %235 = arith.mulf %230, %234 : vector<2x8x8xf32>
    "tpu.trace_start"() <{level = 10 : i32, message = "bqk,bkd->bqd"}> : () -> ()
    %cst_93 = arith.constant dense<0.000000e+00> : vector<2x8x8xf32>
    %236 = tpu.matmul %235, %224, %cst_93 {dimension_numbers = #tpu.dot_dimension_numbers<[2], [1], [1], [2], [0, 0, 0, 1, 1, 2], [0], [0]>} : vector<2x8x8xf32>, vector<2x8x8xf32>, vector<2x8x8xf32> -> vector<2x8x8xf32>
    "tpu.trace_stop"() : () -> ()
    %237 = vector.extract_strided_slice %182 {offsets = [0, 24], sizes = [16, 8], strides = [1, 1]} : vector<16x96xf32> to vector<16x8xf32>
    %238 = vector.shape_cast %237 : vector<16x8xf32> to vector<2x8x8xf32>
    %239 = vector.extract_strided_slice %182 {offsets = [0, 56], sizes = [16, 8], strides = [1, 1]} : vector<16x96xf32> to vector<16x8xf32>
    %240 = vector.shape_cast %239 : vector<16x8xf32> to vector<2x8x8xf32>
    %241 = vector.extract_strided_slice %182 {offsets = [0, 88], sizes = [16, 8], strides = [1, 1]} : vector<16x96xf32> to vector<16x8xf32>
    %242 = vector.shape_cast %241 : vector<16x8xf32> to vector<2x8x8xf32>
    "tpu.trace_start"() <{level = 10 : i32, message = "bqd,bkd->bqk"}> : () -> ()
    %cst_94 = arith.constant dense<0.000000e+00> : vector<2x8x8xf32>
    %243 = tpu.matmul %238, %240, %cst_94 {dimension_numbers = #tpu.dot_dimension_numbers<[2], [2], [1], [1], [0, 0, 0, 1, 1, 1], [0], [0]>} : vector<2x8x8xf32>, vector<2x8x8xf32>, vector<2x8x8xf32> -> vector<2x8x8xf32>
    "tpu.trace_stop"() : () -> ()
    %cst_95 = arith.constant dense<0xFF800000> : vector<2x8xf32>
    %244 = vector.multi_reduction <maximumf>, %243, %cst_95 [2] : vector<2x8x8xf32> to vector<2x8xf32>
    %245 = vector.shape_cast %244 : vector<2x8xf32> to vector<2x8x1xf32>
    %246 = vector.broadcast %245 : vector<2x8x1xf32> to vector<2x8x8xf32>
    %247 = arith.subf %243, %246 : vector<2x8x8xf32>
    %248 = math.exp %247 : vector<2x8x8xf32>
    %cst_96 = arith.constant dense<0.000000e+00> : vector<2x8xf32>
    %249 = vector.multi_reduction <add>, %248, %cst_96 [2] : vector<2x8x8xf32> to vector<2x8xf32>
    %250 = vector.shape_cast %249 : vector<2x8xf32> to vector<2x8x1xf32>
    %251 = tpu.reciprocal %250 {approx = true} : vector<2x8x1xf32> -> vector<2x8x1xf32>
    %252 = vector.broadcast %251 : vector<2x8x1xf32> to vector<2x8x8xf32>
    %253 = arith.mulf %248, %252 : vector<2x8x8xf32>
    "tpu.trace_start"() <{level = 10 : i32, message = "bqk,bkd->bqd"}> : () -> ()
    %cst_97 = arith.constant dense<0.000000e+00> : vector<2x8x8xf32>
    %254 = tpu.matmul %253, %242, %cst_97 {dimension_numbers = #tpu.dot_dimension_numbers<[2], [1], [1], [2], [0, 0, 0, 1, 1, 2], [0], [0]>} : vector<2x8x8xf32>, vector<2x8x8xf32>, vector<2x8x8xf32> -> vector<2x8x8xf32>
    "tpu.trace_stop"() : () -> ()
    %255 = tpu.concatenate %200, %218, %236, %254 in 2 : vector<2x8x8xf32>, vector<2x8x8xf32>, vector<2x8x8xf32>, vector<2x8x8xf32> -> vector<2x8x32xf32>
    %256 = vector.shape_cast %255 : vector<2x8x32xf32> to vector<16x32xf32>
    %257 = arith.truncf %256 : vector<16x32xf32> to vector<16x32xbf16>
    %c1_98 = arith.constant 1 : index
    %c0_99 = arith.constant 0 : index
    %c0_100 = arith.constant 0 : index
    %258 = vector.load %arg6[%c1_98, %c0_99, %c0_100] : memref<2x32x32xbf16, #tpu.memory_space<vmem>>, vector<1x32x32xbf16>
    %259 = vector.shape_cast %258 : vector<1x32x32xbf16> to vector<32x32xbf16>
    %cst_101 = arith.constant dense<0.000000e+00> : vector<16x32xf32>
    %260 = tpu.matmul %257, %259, %cst_101 {dimension_numbers = #tpu.dot_dimension_numbers<[1], [0], [0], [1], [0, 0, 1, 1], [], []>} : vector<16x32xbf16>, vector<32x32xbf16>, vector<16x32xf32> -> vector<16x32xf32>
    %c1_102 = arith.constant 1 : index
    %c0_103 = arith.constant 0 : index
    %c0_104 = arith.constant 0 : index
    %261 = vector.load %arg7[%c1_102, %c0_103, %c0_104] : memref<2x1x32xf32, #tpu.memory_space<vmem>>, vector<1x1x32xf32>
    %262 = vector.shape_cast %261 : vector<1x1x32xf32> to vector<1x32xf32>
    %263 = vector.broadcast %262 : vector<1x32xf32> to vector<16x32xf32>
    %264 = arith.addf %260, %263 : vector<16x32xf32>
    %265 = arith.addf %174, %264 : vector<16x32xf32>
    %c1_105 = arith.constant 1 : index
    %c0_106 = arith.constant 0 : index
    %c0_107 = arith.constant 0 : index
    %266 = vector.load %arg8[%c1_105, %c0_106, %c0_107] : memref<2x1x32xf32, #tpu.memory_space<vmem>>, vector<1x1x32xf32>
    %267 = vector.shape_cast %266 : vector<1x1x32xf32> to vector<1x32xf32>
    %c1_108 = arith.constant 1 : index
    %c0_109 = arith.constant 0 : index
    %c0_110 = arith.constant 0 : index
    %268 = vector.load %arg9[%c1_108, %c0_109, %c0_110] : memref<2x1x32xf32, #tpu.memory_space<vmem>>, vector<1x1x32xf32>
    %269 = vector.shape_cast %268 : vector<1x1x32xf32> to vector<1x32xf32>
    %cst_111 = arith.constant dense<0.000000e+00> : vector<32xf32>
    %270 = vector.multi_reduction <add>, %265, %cst_111 [0] : vector<16x32xf32> to vector<32xf32>
    %271 = vector.shape_cast %270 : vector<32xf32> to vector<1x32xf32>
    %cst_112 = arith.constant 6.250000e-02 : f32
    %272 = vector.broadcast %cst_112 : f32 to vector<1x32xf32>
    %273 = arith.mulf %271, %272 : vector<1x32xf32>
    %274 = arith.mulf %265, %265 : vector<16x32xf32>
    %cst_113 = arith.constant dense<0.000000e+00> : vector<32xf32>
    %275 = vector.multi_reduction <add>, %274, %cst_113 [0] : vector<16x32xf32> to vector<32xf32>
    %276 = vector.shape_cast %275 : vector<32xf32> to vector<1x32xf32>
    %cst_114 = arith.constant 6.250000e-02 : f32
    %277 = vector.broadcast %cst_114 : f32 to vector<1x32xf32>
    %278 = arith.mulf %276, %277 : vector<1x32xf32>
    %279 = arith.mulf %273, %273 : vector<1x32xf32>
    %280 = arith.subf %278, %279 : vector<1x32xf32>
    %cst_115 = arith.constant 9.99999974E-6 : f32
    %281 = vector.broadcast %cst_115 : f32 to vector<1x32xf32>
    %282 = arith.addf %280, %281 : vector<1x32xf32>
    %283 = math.rsqrt %282 : vector<1x32xf32>
    %284 = arith.mulf %283, %267 : vector<1x32xf32>
    %285 = vector.broadcast %273 : vector<1x32xf32> to vector<16x32xf32>
    %286 = arith.subf %265, %285 : vector<16x32xf32>
    %287 = vector.broadcast %284 : vector<1x32xf32> to vector<16x32xf32>
    %288 = arith.mulf %286, %287 : vector<16x32xf32>
    %289 = vector.broadcast %269 : vector<1x32xf32> to vector<16x32xf32>
    %290 = arith.addf %288, %289 : vector<16x32xf32>
    %291 = arith.truncf %290 : vector<16x32xf32> to vector<16x32xbf16>
    %c1_116 = arith.constant 1 : index
    %c0_117 = arith.constant 0 : index
    %c0_118 = arith.constant 0 : index
    %292 = vector.load %arg12[%c1_116, %c0_117, %c0_118] : memref<2x32x64xbf16, #tpu.memory_space<vmem>>, vector<1x32x64xbf16>
    %293 = vector.shape_cast %292 : vector<1x32x64xbf16> to vector<32x64xbf16>
    %cst_119 = arith.constant dense<0.000000e+00> : vector<16x64xf32>
    %294 = tpu.matmul %291, %293, %cst_119 {dimension_numbers = #tpu.dot_dimension_numbers<[1], [0], [0], [1], [0, 0, 1, 1], [], []>} : vector<16x32xbf16>, vector<32x64xbf16>, vector<16x64xf32> -> vector<16x64xf32>
    %c1_120 = arith.constant 1 : index
    %c0_121 = arith.constant 0 : index
    %c0_122 = arith.constant 0 : index
    %295 = vector.load %arg13[%c1_120, %c0_121, %c0_122] : memref<2x1x64xf32, #tpu.memory_space<vmem>>, vector<1x1x64xf32>
    %296 = vector.shape_cast %295 : vector<1x1x64xf32> to vector<1x64xf32>
    %297 = vector.broadcast %296 : vector<1x64xf32> to vector<16x64xf32>
    %298 = arith.addf %294, %297 : vector<16x64xf32>
    %cst_123 = arith.constant 0.000000e+00 : f32
    %299 = vector.broadcast %cst_123 : f32 to vector<16x64xf32>
    %300 = arith.maximumf %298, %299 : vector<16x64xf32>
    %301 = arith.truncf %300 : vector<16x64xf32> to vector<16x64xbf16>
    %c1_124 = arith.constant 1 : index
    %c0_125 = arith.constant 0 : index
    %c0_126 = arith.constant 0 : index
    %302 = vector.load %arg14[%c1_124, %c0_125, %c0_126] : memref<2x64x32xbf16, #tpu.memory_space<vmem>>, vector<1x64x32xbf16>
    %303 = vector.shape_cast %302 : vector<1x64x32xbf16> to vector<64x32xbf16>
    %cst_127 = arith.constant dense<0.000000e+00> : vector<16x32xf32>
    %304 = tpu.matmul %301, %303, %cst_127 {dimension_numbers = #tpu.dot_dimension_numbers<[1], [0], [0], [1], [0, 0, 1, 1], [], []>} : vector<16x64xbf16>, vector<64x32xbf16>, vector<16x32xf32> -> vector<16x32xf32>
    %c1_128 = arith.constant 1 : index
    %c0_129 = arith.constant 0 : index
    %c0_130 = arith.constant 0 : index
    %305 = vector.load %arg15[%c1_128, %c0_129, %c0_130] : memref<2x1x32xf32, #tpu.memory_space<vmem>>, vector<1x1x32xf32>
    %306 = vector.shape_cast %305 : vector<1x1x32xf32> to vector<1x32xf32>
    %307 = vector.broadcast %306 : vector<1x32xf32> to vector<16x32xf32>
    %308 = arith.addf %304, %307 : vector<16x32xf32>
    %309 = arith.addf %290, %308 : vector<16x32xf32>
    %c1_131 = arith.constant 1 : index
    %c0_132 = arith.constant 0 : index
    %c0_133 = arith.constant 0 : index
    %310 = vector.load %arg10[%c1_131, %c0_132, %c0_133] : memref<2x1x32xf32, #tpu.memory_space<vmem>>, vector<1x1x32xf32>
    %311 = vector.shape_cast %310 : vector<1x1x32xf32> to vector<1x32xf32>
    %c1_134 = arith.constant 1 : index
    %c0_135 = arith.constant 0 : index
    %c0_136 = arith.constant 0 : index
    %312 = vector.load %arg11[%c1_134, %c0_135, %c0_136] : memref<2x1x32xf32, #tpu.memory_space<vmem>>, vector<1x1x32xf32>
    %313 = vector.shape_cast %312 : vector<1x1x32xf32> to vector<1x32xf32>
    %cst_137 = arith.constant dense<0.000000e+00> : vector<32xf32>
    %314 = vector.multi_reduction <add>, %309, %cst_137 [0] : vector<16x32xf32> to vector<32xf32>
    %315 = vector.shape_cast %314 : vector<32xf32> to vector<1x32xf32>
    %cst_138 = arith.constant 6.250000e-02 : f32
    %316 = vector.broadcast %cst_138 : f32 to vector<1x32xf32>
    %317 = arith.mulf %315, %316 : vector<1x32xf32>
    %318 = arith.mulf %309, %309 : vector<16x32xf32>
    %cst_139 = arith.constant dense<0.000000e+00> : vector<32xf32>
    %319 = vector.multi_reduction <add>, %318, %cst_139 [0] : vector<16x32xf32> to vector<32xf32>
    %320 = vector.shape_cast %319 : vector<32xf32> to vector<1x32xf32>
    %cst_140 = arith.constant 6.250000e-02 : f32
    %321 = vector.broadcast %cst_140 : f32 to vector<1x32xf32>
    %322 = arith.mulf %320, %321 : vector<1x32xf32>
    %323 = arith.mulf %317, %317 : vector<1x32xf32>
    %324 = arith.subf %322, %323 : vector<1x32xf32>
    %cst_141 = arith.constant 9.99999974E-6 : f32
    %325 = vector.broadcast %cst_141 : f32 to vector<1x32xf32>
    %326 = arith.addf %324, %325 : vector<1x32xf32>
    %327 = math.rsqrt %326 : vector<1x32xf32>
    %328 = arith.mulf %327, %311 : vector<1x32xf32>
    %329 = vector.broadcast %317 : vector<1x32xf32> to vector<16x32xf32>
    %330 = arith.subf %309, %329 : vector<16x32xf32>
    %331 = vector.broadcast %328 : vector<1x32xf32> to vector<16x32xf32>
    %332 = arith.mulf %330, %331 : vector<16x32xf32>
    %333 = vector.broadcast %313 : vector<1x32xf32> to vector<16x32xf32>
    %334 = arith.addf %332, %333 : vector<16x32xf32>
    %335 = vector.shape_cast %334 : vector<16x32xf32> to vector<2x8x32xf32>
    %c0_142 = arith.constant 0 : index
    %c0_143 = arith.constant 0 : index
    %c0_144 = arith.constant 0 : index
    %336 = vector.load %arg16[%c0_142, %c0_143, %c0_144] : memref<2x8x32xf32, #tpu.memory_space<vmem>>, vector<2x8x32xf32>
    tpu.vector_store %arg16[%c0_142, %c0_143, %c0_144], %335 {strides = array<i32>} : memref<2x8x32xf32, #tpu.memory_space<vmem>>, vector<2x8x32xf32>,
    return
  }
}

</mosaic_0001>

<bundles_post_ra>
// kernel: tpu_custom_call.1
= control target key start
LH: loop header
LB: loop body
LE: loop exit
PB: predicated region body
PF: predicated region fallthrough
CT: control target
= control target key end

     0   :  { %s4934_s0 = inlined_call_operand.vmem [shape: f32[2,8,4], index: 0, kind: input, shape index: {}]   ;;  %s4935_s1 = inlined_call_operand.vmem [shape: f32[16,1], index: 1, kind: input, shape index: {}]   ;;  %s4936_s2 = inlined_call_operand.vmem [shape: f32[4,64], index: 2, kind: input, shape index: {}]   ;;  %s4937_s3 = inlined_call_operand.vmem [shape: f32[1,64], index: 3, kind: input, shape index: {}]   ;;  %s4938_s4 = inlined_call_operand.vmem [shape: bf16[2,32,96], index: 4, kind: input, shape index: {}]   ;;  %s4939_s5 = inlined_call_operand.vmem [shape: f32[2,1,96], index: 5, kind: input, shape index: {}]   ;;  %s4940_s6 = inlined_call_operand.vmem [shape: bf16[2,32,32], index: 6, kind: input, shape index: {}]   ;;  %s4941_s7 = inlined_call_operand.vmem [shape: f32[2,1,32], index: 7, kind: input, shape index: {}]   ;;  %s4942_s8 = inlined_call_operand.vmem [shape: f32[2,1,32], index: 8, kind: input, shape index: {}]   ;;  %s4943_s9 = inlined_call_operand.vmem [shape: f32[2,1,32], index: 9, kind: input, shape index: {}]   ;;  %s4944_s10 = inlined_call_operand.vmem [shape: f32[2,1,32], index: 10, kind: input, shape index: {}]   ;;  %s4945_s11 = inlined_call_operand.vmem [shape: f32[2,1,32], index: 11, kind: input, shape index: {}]   ;;  %s4946_s12 = inlined_call_operand.vmem [shape: bf16[2,32,64], index: 12, kind: input, shape index: {}]   ;;  %s4947_s13 = inlined_call_operand.vmem [shape: f32[2,1,64], index: 13, kind: input, shape index: {}]   ;;  %s4948_s14 = inlined_call_operand.vmem [shape: bf16[2,64,32], index: 14, kind: input, shape index: {}]   ;;  %s4949_s15 = inlined_call_operand.vmem [shape: f32[2,1,32], index: 15, kind: input, shape index: {}]   ;;  %s4950_s16 = inlined_call_operand.hbm [shape: f32[2,8,32], index: 16, kind: output, shape index: {}]  }
   0x1   :  { %4956 = sst [smem:[#allocation5_spill]] %s4934_s0 }
   0x2   :  { %v57_v0 = vld [vmem:[%s4936_s2] sm:$0xf]  ;;  %vm72_vm0 = vcmask 1043456   ;;  %s4957_s25 = sld [smem:[#allocation5_spill]]  ;;  %vm65_vm1 = vcmask 31744   ;;  %v152_v4 = vld [vmem:[%s4935_s1 + $0x8] sm:$0xff] }
   0x3   :  { %3889 = vmatprep.subr.msk.mxu0 %vm72_vm0, %v57_v0  ;;  %v151_v3 = vld [vmem:[%s4935_s1] sm:$0xff]  ;;  %v4290_v5 = vmov 0   ;;  %vm154_vm3 = vcmp.gt.f32.partialorder %v152_v4, 0.5 }
   0x4   :  { %3890 = vmatpush3.msk.msra.mxu0 %vm72_vm0, %v57_v0  ;;  %4145 = vset.pattern.permute.xlu0 %v4290_v5  ;;  %vm153_vm2 = vcmp.gt.f32.partialorder %v151_v3, 0.5  ;;  %v156_v7 = vsel %vm154_vm3, 1, %v4290_v5 }
   0x5   :  { %v155_v6 = vsel %vm153_vm2, 1, %v4290_v5 }
   0x6   :  { %158 = vperm.xlu0 %4145, %v155_v6  }
   0x8   :  { %v55_v1 = vld [vmem:[%s4957_s25] sm:$0xff]  ;;  %v56_v2 = vld [vmem:[%s4957_s25 + $0x8] sm:$0xff] }
   0x9   :  { %3891 = vmatprep.mubr.msk.f32.mxu0 %vm65_vm1, %v55_v1 }
   0xa   :  { %3892 = vmatmul.mubr.msk.f32.vlgmr.msra.gmra.mxu0 %vm65_vm1, %v56_v2  ;;  %161 = vperm.xlu0 %4145, %v156_v7  }
   0xb   :  { %21 = vsyncpa [#allocation3], 0  ;;  %v4291_v8 = vmov 0.0   ;;  %v4176_v9 = vld [vmem:[%s4938_s4 + $0x8] sm:$0xff]   ;;  %v4177_v10 = vld [vmem:[%s4938_s4] sm:$0xff]   ;;  %vm4292_vm4 = vmmov 0  }
   0xc   :  { %3894 = vmatprep.subr.bf16.mxu1 %v4291_v8  ;;  %3902 = vmatprep.subr.mxu0 %v4291_v8  ;;  %v3674_v12 = vld [vmem:[%s4937_s3] ss:$0 sm:$0xff]  ;;  %s4293_s21 = smov 96   ;;  %vm199_vm7 = vcmask 261120   ;;  %vm247_vm8 = vcmask 64512   ;;  %s4294_s23 = smov 64  }
   0xd   :  { %3895 = vmatpush3.bf16.msra.mxu1 %v4176_v9  ;;  %3898 = vmatprep.mubr.msk.bf16.mxu1 %vm4292_vm4, %v4291_v8  ;;  %v3678_v23 = vld [vmem:[%s4939_s5] ss:$0 sm:$0xff]  ;;  %s4295_s24 = smov 88   ;;  %s4296_s25 = smov 120   ;;  %vm1589_vm9 = vcmask 130048   ;;  %vm1592_vm10 = vcmask 195584  }
   0xe   :  { %3896 = vmatprep.subr.bf16.mxu1 %v4291_v8  ;;  %3904 = vmatprep.mubr.msk.f32.mxu0 %vm4292_vm4, %v4291_v8  ;;  %s4297_s26 = smov 56   ;;  %s4298_s27 = smov 80   ;;  %vm1820_vm11 = vcmask 523264  }
   0xf   :  { %s4299_s28 = smov 112   ;;  %s4300_s29 = smov 48  }
  0x10   :  { %s4301_s30 = smov 72   ;;  %s4302_s0 = smov 104  }
  0x11   :  { %3897 = vmatpush3.bf16.msra.mxu1 %v4177_v10  ;;  %s4303_s2 = smov 40   ;;  %s4954_s17 = smov 8  }
  0x12   :  { %3917 = vmatprep.subr.mxu1 %v4291_v8  ;;  %s4953_s1 = smov 16   ;;  %s4952_s22 = smov 24  }
  0x81   :  { %v159_v16 = vpop.permute.xlu0 %158 }
  0x82   :  { %vm163_vm5 = vcmp.eq.s32.totalorder %v159_v16, 1 }
  0x85   :  { %v162_v18 = vpop.permute.xlu0 %161 }
  0x86   :  { %vm164_vm6 = vcmp.eq.s32.totalorder %v162_v18, 1 }
  0xca   :  { %v3893_v11 = vpop.f32.mrf.mxu0 }
  0xcb   :  { %v148_v15 = vadd.f32 %v3893_v11, %v3674_v12 }
  0xcc   :  { %v142_v13 = vpop.f32.mrf.mxu0 }
  0xcd   :  { %v143_v14 = vadd.f32 %v3674_v12, %v142_v13 }
  0xcf   :  { %167 = vrot.lane.b32.xlu1 %v143_v14, %s4293_s21 }
  0xd3   :  { %169 = vrot.lane.b32.xlu1 %v148_v15, %s4293_s21 }
 0x141   :  { %v168_v17 = vpop.permute.xlu1 %167 }
 0x142   :  { %v4428_v20 = vsel %vm163_vm5, %v143_v14, %v168_v17 }
 0x145   :  { %v170_v19 = vpop.permute.xlu1 %169 }
 0x146   :  { %v4430_v21 = vsel %vm164_vm6, %v148_v15, %v170_v19 }
 0x147   :  { %v175_v22 = vpack.c.bf16 %v4430_v21, %v4428_v20 }
 0x149   :  { %3899 = vmatmul.mubr.msk.bf16.vlgmr.msra.gmra.mxu1 %vm199_vm7, %v175_v22 }
 0x14a   :  { %3919 = vmatprep.mubr.msk.f32.mxu1 %vm4292_vm4, %v4291_v8 }
 0x209   :  { %v237_v24 = vpop.f32.mrf.mxu1 }
 0x20a   :  { %v4440_v25 = vadd.f32 %v3678_v23, %v237_v24 }
 0x20b   :  { %v3900_v26 = vpop.f32.mrf.mxu1 }
 0x20c   :  { %245 = vrot.lane.b32.xlu0 %v4440_v25, %s4293_s21 }
 0x20d   :  { %v240_v27 = vpop.f32.mrf.mxu1 }
 0x20e   :  { %v4444_v28 = vadd.f32 %v3678_v23, %v240_v27 }
 0x20f   :  { %v3901_v29 = vpop.f32.mrf.mxu1 }
 0x210   :  { %323 = vrot.lane.b32.xlu1 %v4444_v28, %s4293_s21 }
 0x27e   :  { %v246_v30 = vpop.permute.xlu0 %245 }
 0x27f   :  { %3903 = vmatpush3.xpose.msk.msra.mxu0 %vm247_vm8, %v246_v30 }
 0x280   :  { %3907 = vmatprep.subr.mxu0 %v4291_v8 }
 0x282   :  { %3905 = vmatmul.mubr.msk.f32.vlgmr.msra.gmra.mxu0 %vm247_vm8, %v4440_v25  ;;  %v324_v31 = vpop.permute.xlu1 %323 }
 0x283   :  { %3908 = vmatpush3.xpose.msk.msra.mxu0 %vm247_vm8, %v324_v31  ;;  %3909 = vmatprep.mubr.msk.f32.mxu0 %vm4292_vm4, %v4291_v8 }
 0x284   :  { %3912 = vmatprep.subr.mxu0 %v4291_v8 }
 0x286   :  { %3910 = vmatmul.mubr.msk.f32.vlgmr.msra.gmra.mxu0 %vm247_vm8, %v4444_v28 }
 0x287   :  { %3914 = vmatprep.mubr.msk.f32.mxu0 %vm4292_vm4, %v4291_v8 }
 0x342   :  { %v318_v32 = vpop.f32.mrf.mxu0 }
 0x343   :  { %v399_v33 = vsel %vm247_vm8, %v318_v32, -inf }
 0x344   :  { %400 = vmax.xlane.f32.xlu0 %v399_v33  ;;  %v3906_v34 = vpop.f32.mrf.mxu0 }
 0x346   :  { %v395_v35 = vpop.f32.mrf.mxu0 }
 0x347   :  { %v402_v36 = vsel %vm247_vm8, %v395_v35, -inf }
 0x348   :  { %403 = vmax.xlane.f32.xlu1 %v402_v36  ;;  %v3911_v37 = vpop.f32.mrf.mxu0 }
 0x359   :  { %421 = vrot.lane.b32.xlu1 %v4440_v25, %s4294_s23 }
 0x35d   :  { %575 = vrot.lane.b32.xlu1 %v4440_v25, %s4295_s24 }
 0x361   :  { %653 = vrot.lane.b32.xlu1 %v4444_v28, %s4295_s24 }
 0x365   :  { %651 = vrot.lane.b32.xlu1 %v4444_v28, %s4296_s25 }
 0x3cd   :  { %v401_v38 = vpop.xlane.xlu0 %400 }
 0x3ce   :  { %v405_v39 = vsub.f32 %v318_v32, %v401_v38 }
 0x3d0   :  { %v407_v40 = vmul.f32 1.442695, %v405_v39 }
 0x3d1   :  { %v404_v41 = vpop.xlane.xlu1 %403 }
 0x3d2   :  { %4196 = vpow2.f32 %v407_v40  ;;  %v406_v42 = vsub.f32 %v395_v35, %v404_v41 }
 0x3d4   :  { %v409_v43 = vmul.f32 1.442695, %v406_v42 }
 0x3d5   :  { %v422_v44 = vpop.permute.xlu1 %421 }
 0x3d6   :  { %4198 = vpow2.f32 %v409_v43  ;;  %3913 = vmatpush3.msra.mxu0 %v422_v44 }
 0x3d7   :  { %3922 = vmatprep.subr.mxu0 %v4291_v8 }
 0x3d9   :  { %v576_v52 = vpop.permute.xlu1 %575 }
 0x3dd   :  { %v654_v56 = vpop.permute.xlu1 %653 }
 0x3df   :  { %v4197_v45 = vpop.eup %4196 }
 0x3e0   :  { %v411_v46 = vsel %vm247_vm8, %v4197_v45, 0.0 }
 0x3e1   :  { %412 = vadd.xlane.f32.xlu0 %v411_v46  ;;  %v652_v59 = vpop.permute.xlu1 %651 }
 0x3e3   :  { %v4199_v47 = vpop.eup %4198 }
 0x3e4   :  { %v414_v48 = vsel %vm247_vm8, %v4199_v47, 0.0 }
 0x3e5   :  { %415 = vadd.xlane.f32.xlu0 %v414_v48 }
 0x3fb   :  { %497 = vrot.lane.b32.xlu0 %v4444_v28, %s4294_s23 }
 0x3ff   :  { %573 = vrot.lane.b32.xlu0 %v4440_v25, %s4296_s25 }
 0x46a   :  { %v413_v49 = vpop.xlane.xlu0 %412 }
 0x46b   :  { %4200 = vrcp.f32 %v413_v49 }
 0x46e   :  { %v416_v50 = vpop.xlane.xlu0 %415 }
 0x46f   :  { %4202 = vrcp.f32 %v416_v50 }
 0x472   :  { %v498_v51 = vpop.permute.xlu0 %497 }
 0x473   :  { %3918 = vmatpush3.msra.mxu1 %v498_v51 }
 0x474   :  { %3927 = vmatprep.subr.mxu1 %v4291_v8 }
 0x476   :  { %v574_v58 = vpop.permute.xlu0 %573 }
 0x478   :  { %v4201_v53 = vpop.eup %4200 }
 0x479   :  { %v419_v54 = vmul.f32 %v4201_v53, %v4197_v45 }
 0x47b   :  { %3915 = vmatmul.mubr.msk.f32.vlgmr.msra.gmra.mxu0 %vm247_vm8, %v419_v54 }
 0x47c   :  { %v4203_v55 = vpop.eup %4202  ;;  %3923 = vmatpush3.xpose.msk.msra.mxu0 %vm247_vm8, %v576_v52  ;;  %3924 = vmatprep.mubr.msk.f32.mxu0 %vm4292_vm4, %v4291_v8 }
 0x47d   :  { %v420_v57 = vmul.f32 %v4203_v55, %v4199_v47  ;;  %3932 = vmatprep.subr.mxu0 %v4291_v8 }
 0x47f   :  { %3920 = vmatmul.mubr.msk.f32.vlgmr.msra.gmra.mxu1 %vm247_vm8, %v420_v57  ;;  %3925 = vmatmul.mubr.msk.f32.vlgmr.msra.gmra.mxu0 %vm247_vm8, %v574_v58 }
 0x480   :  { %3928 = vmatpush3.xpose.msk.msra.mxu1 %vm247_vm8, %v654_v56  ;;  %3929 = vmatprep.mubr.msk.f32.mxu1 %vm4292_vm4, %v4291_v8 }
 0x481   :  { %3937 = vmatprep.subr.mxu1 %v4291_v8  ;;  %3934 = vmatprep.mubr.msk.f32.mxu0 %vm4292_vm4, %v4291_v8 }
 0x483   :  { %3930 = vmatmul.mubr.msk.f32.vlgmr.msra.gmra.mxu1 %vm247_vm8, %v652_v59 }
 0x484   :  { %3939 = vmatprep.mubr.msk.f32.mxu1 %vm4292_vm4, %v4291_v8 }
 0x53b   :  { %v4494_v60 = vpop.f32.mrf.mxu0 }
 0x53d   :  { %v3916_v61 = vpop.f32.mrf.mxu0 }
 0x53f   :  { %v4496_v62 = vpop.f32.mrf.mxu1  ;;  %v647_v63 = vpop.f32.mrf.mxu0 }
 0x540   :  { %v729_v0 = vsel %vm247_vm8, %v647_v63, -inf }
 0x541   :  { %730 = vmax.xlane.f32.xlu0 %v729_v0  ;;  %v3921_v1 = vpop.f32.mrf.mxu1  ;;  %v3926_v2 = vpop.f32.mrf.mxu0 }
 0x543   :  { %v725_v3 = vpop.f32.mrf.mxu1 }
 0x544   :  { %v732_v4 = vsel %vm247_vm8, %v725_v3, -inf }
 0x545   :  { %733 = vmax.xlane.f32.xlu1 %v732_v4  ;;  %v3931_v5 = vpop.f32.mrf.mxu1 }
 0x556   :  { %751 = vrot.lane.b32.xlu1 %v4440_v25, %s4297_s26 }
 0x55a   :  { %905 = vrot.lane.b32.xlu1 %v4440_v25, %s4298_s27 }
 0x55e   :  { %983 = vrot.lane.b32.xlu1 %v4444_v28, %s4298_s27 }
 0x562   :  { %981 = vrot.lane.b32.xlu1 %v4444_v28, %s4299_s28 }
 0x5ca   :  { %v731_v6 = vpop.xlane.xlu0 %730 }
 0x5cb   :  { %v735_v7 = vsub.f32 %v647_v63, %v731_v6 }
 0x5cd   :  { %v737_v9 = vmul.f32 1.442695, %v735_v7 }
 0x5ce   :  { %v734_v10 = vpop.xlane.xlu1 %733 }
 0x5cf   :  { %4204 = vpow2.f32 %v737_v9  ;;  %v736_v11 = vsub.f32 %v725_v3, %v734_v10 }
 0x5d1   :  { %v739_v12 = vmul.f32 1.442695, %v736_v11 }
 0x5d2   :  { %v752_v13 = vpop.permute.xlu1 %751 }
 0x5d3   :  { %4206 = vpow2.f32 %v739_v12  ;;  %3933 = vmatpush3.msra.mxu0 %v752_v13 }
 0x5d4   :  { %3942 = vmatprep.subr.mxu0 %v4291_v8 }
 0x5d6   :  { %v906_v23 = vpop.permute.xlu1 %905 }
 0x5da   :  { %v984_v29 = vpop.permute.xlu1 %983 }
 0x5dc   :  { %v4205_v14 = vpop.eup %4204 }
 0x5dd   :  { %v741_v15 = vsel %vm247_vm8, %v4205_v14, 0.0 }
 0x5de   :  { %742 = vadd.xlane.f32.xlu0 %v741_v15  ;;  %v982_v32 = vpop.permute.xlu1 %981 }
 0x5e0   :  { %v4207_v16 = vpop.eup %4206 }
 0x5e1   :  { %v744_v17 = vsel %vm247_vm8, %v4207_v16, 0.0 }
 0x5e2   :  { %745 = vadd.xlane.f32.xlu0 %v744_v17 }
 0x5f8   :  { %827 = vrot.lane.b32.xlu0 %v4444_v28, %s4297_s26 }
 0x5fc   :  { %903 = vrot.lane.b32.xlu0 %v4440_v25, %s4299_s28 }
 0x667   :  { %v743_v18 = vpop.xlane.xlu0 %742 }
 0x668   :  { %4208 = vrcp.f32 %v743_v18 }
 0x66b   :  { %v746_v19 = vpop.xlane.xlu0 %745 }
 0x66c   :  { %4210 = vrcp.f32 %v746_v19 }
 0x66f   :  { %v828_v22 = vpop.permute.xlu0 %827 }
 0x670   :  { %3938 = vmatpush3.msra.mxu1 %v828_v22 }
 0x671   :  { %3947 = vmatprep.subr.mxu1 %v4291_v8 }
 0x673   :  { %v904_v31 = vpop.permute.xlu0 %903 }
 0x675   :  { %v4209_v24 = vpop.eup %4208 }
 0x676   :  { %v749_v26 = vmul.f32 %v4209_v24, %v4205_v14 }
 0x678   :  { %3935 = vmatmul.mubr.msk.f32.vlgmr.msra.gmra.mxu0 %vm247_vm8, %v749_v26 }
 0x679   :  { %v4211_v27 = vpop.eup %4210  ;;  %3943 = vmatpush3.xpose.msk.msra.mxu0 %vm247_vm8, %v906_v23  ;;  %3944 = vmatprep.mubr.msk.f32.mxu0 %vm4292_vm4, %v4291_v8 }
 0x67a   :  { %v750_v30 = vmul.f32 %v4211_v27, %v4207_v16  ;;  %3952 = vmatprep.subr.mxu0 %v4291_v8 }
 0x67c   :  { %3940 = vmatmul.mubr.msk.f32.vlgmr.msra.gmra.mxu1 %vm247_vm8, %v750_v30  ;;  %3945 = vmatmul.mubr.msk.f32.vlgmr.msra.gmra.mxu0 %vm247_vm8, %v904_v31 }
 0x67d   :  { %3948 = vmatpush3.xpose.msk.msra.mxu1 %vm247_vm8, %v984_v29  ;;  %3949 = vmatprep.mubr.msk.f32.mxu1 %vm4292_vm4, %v4291_v8 }
 0x67e   :  { %3957 = vmatprep.subr.mxu1 %v4291_v8  ;;  %3954 = vmatprep.mubr.msk.f32.mxu0 %vm4292_vm4, %v4291_v8 }
 0x680   :  { %3950 = vmatmul.mubr.msk.f32.vlgmr.msra.gmra.mxu1 %vm247_vm8, %v982_v32 }
 0x681   :  { %3959 = vmatprep.mubr.msk.f32.mxu1 %vm4292_vm4, %v4291_v8 }
 0x738   :  { %v4532_v33 = vpop.f32.mrf.mxu0 }
 0x73a   :  { %v3936_v34 = vpop.f32.mrf.mxu0 }
 0x73c   :  { %v4534_v35 = vpop.f32.mrf.mxu1  ;;  %v977_v36 = vpop.f32.mrf.mxu0 }
 0x73d   :  { %v4146_v37 = vpack.i.bf16 %v4534_v35, %v4532_v33  ;;  %v1059_v38 = vsel %vm247_vm8, %v977_v36, -inf }
 0x73e   :  { %1060 = vmax.xlane.f32.xlu0 %v1059_v38  ;;  %v3941_v39 = vpop.f32.mrf.mxu1  ;;  %v3946_v40 = vpop.f32.mrf.mxu0 }
 0x740   :  { %v1055_v41 = vpop.f32.mrf.mxu1 }
 0x741   :  { %v1062_v42 = vsel %vm247_vm8, %v1055_v41, -inf }
 0x742   :  { %1063 = vmax.xlane.f32.xlu1 %v1062_v42  ;;  %v3951_v43 = vpop.f32.mrf.mxu1 }
 0x753   :  { %1081 = vrot.lane.b32.xlu1 %v4440_v25, %s4300_s29 }
 0x757   :  { %1235 = vrot.lane.b32.xlu1 %v4440_v25, %s4301_s30 }
 0x75b   :  { %1313 = vrot.lane.b32.xlu1 %v4444_v28, %s4301_s30 }
 0x75f   :  { %1311 = vrot.lane.b32.xlu1 %v4444_v28, %s4302_s0 }
 0x7c7   :  { %v1061_v44 = vpop.xlane.xlu0 %1060 }
 0x7c8   :  { %v1065_v45 = vsub.f32 %v977_v36, %v1061_v44 }
 0x7ca   :  { %v1067_v46 = vmul.f32 1.442695, %v1065_v45 }
 0x7cb   :  { %v1064_v47 = vpop.xlane.xlu1 %1063 }
 0x7cc   :  { %4212 = vpow2.f32 %v1067_v46  ;;  %v1066_v48 = vsub.f32 %v1055_v41, %v1064_v47 }
 0x7ce   :  { %v1069_v49 = vmul.f32 1.442695, %v1066_v48 }
 0x7cf   :  { %v1082_v50 = vpop.permute.xlu1 %1081 }
 0x7d0   :  { %4214 = vpow2.f32 %v1069_v49  ;;  %3953 = vmatpush3.msra.mxu0 %v1082_v50 }
 0x7d1   :  { %3962 = vmatprep.subr.mxu0 %v4291_v8 }
 0x7d3   :  { %v1236_v58 = vpop.permute.xlu1 %1235 }
 0x7d7   :  { %v1314_v0 = vpop.permute.xlu1 %1313 }
 0x7d9   :  { %v4213_v51 = vpop.eup %4212 }
 0x7da   :  { %v1071_v52 = vsel %vm247_vm8, %v4213_v51, 0.0 }
 0x7db   :  { %1072 = vadd.xlane.f32.xlu0 %v1071_v52  ;;  %v1312_v3 = vpop.permute.xlu1 %1311 }
 0x7dd   :  { %v4215_v53 = vpop.eup %4214 }
 0x7de   :  { %v1074_v54 = vsel %vm247_vm8, %v4215_v53, 0.0 }
 0x7df   :  { %1075 = vadd.xlane.f32.xlu0 %v1074_v54 }
 0x7f5   :  { %1157 = vrot.lane.b32.xlu0 %v4444_v28, %s4300_s29 }
 0x7f9   :  { %1233 = vrot.lane.b32.xlu0 %v4440_v25, %s4302_s0 }
 0x864   :  { %v1073_v55 = vpop.xlane.xlu0 %1072 }
 0x865   :  { %4216 = vrcp.f32 %v1073_v55 }
 0x868   :  { %v1076_v56 = vpop.xlane.xlu0 %1075 }
 0x869   :  { %4218 = vrcp.f32 %v1076_v56 }
 0x86c   :  { %v1158_v57 = vpop.permute.xlu0 %1157 }
 0x86d   :  { %3958 = vmatpush3.msra.mxu1 %v1158_v57 }
 0x86e   :  { %3967 = vmatprep.subr.mxu1 %v4291_v8 }
 0x870   :  { %v1234_v2 = vpop.permute.xlu0 %1233 }
 0x872   :  { %v4217_v59 = vpop.eup %4216 }
 0x873   :  { %v1079_v61 = vmul.f32 %v4217_v59, %v4213_v51  ;;  %v4182_v59 = vld [vmem:[%s4948_s14 + $0x18] sm:$0xff]  }
 0x875   :  { %3955 = vmatmul.mubr.msk.f32.vlgmr.msra.gmra.mxu0 %vm247_vm8, %v1079_v61  ;;  %v3706_v61 = vld [vmem:[%s4941_s7] ss:$0 sm:$0xff] }
 0x876   :  { %v4219_v63 = vpop.eup %4218  ;;  %3963 = vmatpush3.xpose.msk.msra.mxu0 %vm247_vm8, %v1236_v58  ;;  %3964 = vmatprep.mubr.msk.f32.mxu0 %vm4292_vm4, %v4291_v8 }
 0x877   :  { %v1080_v1 = vmul.f32 %v4219_v63, %v4215_v53  ;;  %3972 = vmatprep.subr.mxu0 %v4291_v8 }
 0x879   :  { %3960 = vmatmul.mubr.msk.f32.vlgmr.msra.gmra.mxu1 %vm247_vm8, %v1080_v1  ;;  %3965 = vmatmul.mubr.msk.f32.vlgmr.msra.gmra.mxu0 %vm247_vm8, %v1234_v2 }
 0x87a   :  { %3968 = vmatpush3.xpose.msk.msra.mxu1 %vm247_vm8, %v1314_v0  ;;  %3969 = vmatprep.mubr.msk.f32.mxu1 %vm4292_vm4, %v4291_v8 }
 0x87b   :  { %3977 = vmatprep.subr.mxu1 %v4291_v8  ;;  %3974 = vmatprep.mubr.msk.f32.mxu0 %vm4292_vm4, %v4291_v8 }
 0x87d   :  { %3970 = vmatmul.mubr.msk.f32.vlgmr.msra.gmra.mxu1 %vm247_vm8, %v1312_v3 }
 0x87e   :  { %3979 = vmatprep.mubr.msk.f32.mxu1 %vm4292_vm4, %v4291_v8 }
 0x935   :  { %v1153_v4 = vpop.f32.mrf.mxu0 }
 0x937   :  { %v3956_v5 = vpop.f32.mrf.mxu0 }
 0x939   :  { %v1229_v6 = vpop.f32.mrf.mxu1  ;;  %v1307_v7 = vpop.f32.mrf.mxu0 }
 0x93a   :  { %v1389_v9 = vsel %vm247_vm8, %v1307_v7, -inf  ;;  %v4151_v15 = vpack.i.bf16 %v1229_v6, %v1153_v4 }
 0x93b   :  { %1390 = vmax.xlane.f32.xlu0 %v1389_v9  ;;  %v3961_v10 = vpop.f32.mrf.mxu1  ;;  %v3966_v11 = vpop.f32.mrf.mxu0 }
 0x93d   :  { %v1385_v12 = vpop.f32.mrf.mxu1 }
 0x93e   :  { %v1392_v13 = vsel %vm247_vm8, %v1385_v12, -inf }
 0x93f   :  { %1393 = vmax.xlane.f32.xlu1 %v1392_v13  ;;  %v3971_v14 = vpop.f32.mrf.mxu1 }
 0x950   :  { %1411 = vrot.lane.b32.xlu1 %v4440_v25, %s4303_s2 }
 0x954   :  { %4147 = vrot.lane.b32.xlu1 %v4146_v37, %s4954_s17  ;;  %v4179_v37 = vld [vmem:[%s4940_s6] sm:$0xff]  }
 0x958   :  { %4152 = vrot.lane.b32.xlu1 %v4151_v15, %s4953_s1 }
 0x9c4   :  { %v1391_v16 = vpop.xlane.xlu0 %1390 }
 0x9c5   :  { %v1395_v17 = vsub.f32 %v1307_v7, %v1391_v16 }
 0x9c7   :  { %v1397_v18 = vmul.f32 1.442695, %v1395_v17 }
 0x9c8   :  { %v1394_v19 = vpop.xlane.xlu1 %1393 }
 0x9c9   :  { %4220 = vpow2.f32 %v1397_v18  ;;  %v1396_v22 = vsub.f32 %v1385_v12, %v1394_v19 }
 0x9cb   :  { %v1399_v23 = vmul.f32 1.442695, %v1396_v22 }
 0x9cc   :  { %v1412_v24 = vpop.permute.xlu1 %1411 }
 0x9cd   :  { %4222 = vpow2.f32 %v1399_v23  ;;  %3973 = vmatpush3.msra.mxu0 %v1412_v24 }
 0x9ce   :  { %3998 = vmatprep.subr.bf16.mxu0 %v4291_v8 }
 0x9d0   :  { %v4148_v43 = vpop.permute.xlu1 %4147 }
 0x9d1   :  { %v4150_v45 = vunpack.i.h.bf16 %v4148_v43  ;;  %v4149_v46 = vunpack.i.l.bf16 %v4148_v43 }
 0x9d3   :  { %v1588_v50 = vsel %vm247_vm8, %v4496_v62, %v4150_v45  ;;  %v1587_v51 = vsel %vm247_vm8, %v4494_v60, %v4149_v46  ;;  %v4180_v60 = vld [vmem:[%s4946_s12 + $0x8] sm:$0xff]   ;;  %v4181_v62 = vld [vmem:[%s4946_s12] sm:$0xff]  }
 0x9d4   :  { %v4153_v44 = vpop.permute.xlu1 %4152 }
 0x9d5   :  { %v4155_v47 = vunpack.i.h.bf16 %v4153_v44  ;;  %v4154_v48 = vunpack.i.l.bf16 %v4153_v44 }
 0x9d6   :  { %v4221_v25 = vpop.eup %4220 }
 0x9d7   :  { %v1401_v26 = vsel %vm247_vm8, %v4221_v25, 0.0  ;;  %v1590_v54 = vsel %vm1589_vm9, %v1587_v51, %v4154_v48  ;;  %v1591_v55 = vsel %vm1589_vm9, %v1588_v50, %v4155_v47  ;;  %v4183_v48 = vld [vmem:[%s4948_s14 + $0x10] sm:$0xff]   ;;  %v4185_v50 = vld [vmem:[%s4948_s14] sm:$0xff]  }
 0x9d8   :  { %1402 = vadd.xlane.f32.xlu0 %v1401_v26  ;;  %v3711_v51 = vld [vmem:[%s4947_s13] ss:$0 sm:$0xff] }
 0x9da   :  { %v4223_v27 = vpop.eup %4222 }
 0x9db   :  { %v1404_v29 = vsel %vm247_vm8, %v4223_v27, 0.0 }
 0x9dc   :  { %1405 = vadd.xlane.f32.xlu0 %v1404_v29 }
 0x9f2   :  { %1487 = vrot.lane.b32.xlu0 %v4444_v28, %s4303_s2  ;;  %v4178_v28 = vld [vmem:[%s4940_s6 + $0x8] sm:$0xff]  }
 0xa61   :  { %v1403_v30 = vpop.xlane.xlu0 %1402 }
 0xa62   :  { %4224 = vrcp.f32 %v1403_v30 }
 0xa65   :  { %v1406_v31 = vpop.xlane.xlu0 %1405 }
 0xa66   :  { %4226 = vrcp.f32 %v1406_v31 }
 0xa69   :  { %v1488_v32 = vpop.permute.xlu0 %1487 }
 0xa6a   :  { %3978 = vmatpush3.msra.mxu1 %v1488_v32 }
 0xa6b   :  { %3982 = vmatprep.subr.bf16.mxu1 %v4291_v8 }
 0xa6f   :  { %v4225_v33 = vpop.eup %4224 }
 0xa70   :  { %v1409_v34 = vmul.f32 %v4225_v33, %v4221_v25 }
 0xa72   :  { %3975 = vmatmul.mubr.msk.f32.vlgmr.msra.gmra.mxu0 %vm247_vm8, %v1409_v34  ;;  %v1696_v34 = vlaneseq }
 0xa73   :  { %v4227_v35 = vpop.eup %4226  ;;  %4006 = vmatprep.mubr.msk.bf16.mxu0 %vm4292_vm4, %v4291_v8  ;;  %3999 = vmatpush3.bf16.msra.mxu0 %v4182_v59  ;;  %v4186_v59 = vld [vmem:[%s4938_s4 + $0x18] sm:$0xff]  }
 0xa74   :  { %v1410_v36 = vmul.f32 %v4227_v35, %v4223_v27  ;;  %4000 = vmatprep.subr.bf16.mxu0 %v4291_v8  ;;  %v1697_v35 = vshrl.u32 %v1696_v34, 7 }
 0xa76   :  { %3980 = vmatmul.mubr.msk.f32.vlgmr.msra.gmra.mxu1 %vm247_vm8, %v1410_v36  ;;  %v1665_v36 = vld [vmem:[%s4942_s8] sm:$0x1] }
 0xa77   :  { %3986 = vmatprep.mubr.msk.bf16.mxu1 %vm4292_vm4, %v4291_v8  ;;  %3983 = vmatpush3.bf16.msra.mxu1 %v4178_v28  ;;  %v4637_v28 = vsub.s32 0, %v1697_v35  ;;  %v1867_v35 = vld [vmem:[%s4944_s10] sm:$0x1] }
 0xa78   :  { %3984 = vmatprep.subr.bf16.mxu1 %v4291_v8  ;;  %4001 = vmatpush3.bf16.msra.mxu0 %v4183_v48 }
 0xa79   :  { %4002 = vmatprep.subr.bf16.mxu0 %v4291_v8 }
 0xa7b   :  { %3985 = vmatpush3.bf16.msra.mxu1 %v4179_v37 }
 0xa7c   :  { %3990 = vmatprep.subr.bf16.mxu1 %v4291_v8 }
 0xb32   :  { %v1483_v38 = vpop.f32.mrf.mxu0 }
 0xb34   :  { %v3976_v39 = vpop.f32.mrf.mxu0 }
 0xb36   :  { %v1559_v40 = vpop.f32.mrf.mxu1 }
 0xb37   :  { %v4156_v41 = vpack.i.bf16 %v1559_v40, %v1483_v38 }
 0xb38   :  { %v3981_v42 = vpop.f32.mrf.mxu1 }
 0xb39   :  { %4157 = vrot.lane.b32.xlu0 %v4156_v41, %s4952_s22  ;;  %v3710_v42 = vld [vmem:[%s4943_s9] ss:$0 sm:$0xff] }
 0xbab   :  { %v4158_v49 = vpop.permute.xlu0 %4157 }
 0xbac   :  { %v4160_v52 = vunpack.i.h.bf16 %v4158_v49  ;;  %v4159_v53 = vunpack.i.l.bf16 %v4158_v49  ;;  %v4184_v49 = vld [vmem:[%s4948_s14 + $0x8] sm:$0xff]  }
 0xbad   :  { %4003 = vmatpush3.bf16.msra.mxu0 %v4184_v49 }
 0xbae   :  { %v1594_v56 = vsel %vm1592_vm10, %v1591_v55, %v4160_v52  ;;  %v1593_v57 = vsel %vm1592_vm10, %v1590_v54, %v4159_v53  ;;  %4004 = vmatprep.subr.bf16.mxu0 %v4291_v8 }
 0xbaf   :  { %v1595_v58 = vpack.c.bf16 %v1594_v56, %v1593_v57 }
 0xbb1   :  { %3987 = vmatmul.mubr.msk.bf16.vlgmr.msra.gmra.mxu1 %vm199_vm7, %v1595_v58  ;;  %4005 = vmatpush3.bf16.msra.mxu0 %v4185_v50 }
 0xbb2   :  { %3994 = vmatprep.mubr.msk.bf16.mxu1 %vm4292_vm4, %v4291_v8  ;;  %3991 = vmatpush3.bf16.msra.mxu1 %v4180_v60 }
 0xbb3   :  { %3992 = vmatprep.subr.bf16.mxu1 %v4291_v8  ;;  %4028 = vmatprep.subr.mxu0 %v4291_v8 }
 0xbb6   :  { %3993 = vmatpush3.bf16.msra.mxu1 %v4181_v62 }
 0xbb7   :  { %4010 = vmatprep.subr.bf16.mxu1 %v4291_v8 }
 0xc71   :  { %v1656_v63 = vpop.f32.mrf.mxu1 }
 0xc72   :  { %v1657_v0 = vadd.f32 %v3706_v61, %v1656_v63  ;;  %v3715_v63 = vld [vmem:[%s4949_s15] ss:$0 sm:$0xff] }
 0xc73   :  { %v3988_v1 = vpop.f32.mrf.mxu1 }
 0xc74   :  { %v1663_v2 = vadd.f32 %v1657_v0, %v4428_v20 }
 0xc75   :  { %v1659_v3 = vpop.f32.mrf.mxu1 }
 0xc76   :  { %v1660_v4 = vadd.f32 %v3706_v61, %v1659_v3  ;;  %v1677_v6 = vmul.f32 %v1663_v2, %v1663_v2  ;;  %v1667_v9 = vsel %vm199_vm7, %v1663_v2, 0.0  ;;  %v4187_v61 = vld [vmem:[%s4938_s4 + $0x10] sm:$0xff]  }
 0xc77   :  { %v3989_v5 = vpop.f32.mrf.mxu1 }
 0xc78   :  { %v1664_v7 = vadd.f32 %v1660_v4, %v4430_v21  ;;  %v1679_v13 = vsel %vm199_vm7, %v1677_v6, 0.0 }
 0xc7a   :  { %v1668_v10 = vsel %vm199_vm7, %v1664_v7, 0.0  ;;  %v1678_v11 = vmul.f32 %v1664_v7, %v1664_v7 }
 0xc7b   :  { %v1669_v12 = vadd.f32 %v1668_v10, %v1667_v9 }
 0xc7c   :  { %v1680_v14 = vsel %vm199_vm7, %v1678_v11, 0.0 }
 0xc7d   :  { %v1670_v15 = vrot.slane %v1669_v12, 4  ;;  %v1681_v16 = vadd.f32 %v1680_v14, %v1679_v13 }
 0xc7f   :  { %v1671_v17 = vadd.f32 %v1670_v15, %v1669_v12  ;;  %v1682_v20 = vrot.slane %v1681_v16, 4 }
 0xc81   :  { %v1672_v18 = vrot.slane %v1671_v17, 2  ;;  %v1683_v19 = vadd.f32 %v1682_v20, %v1681_v16 }
 0xc83   :  { %v1673_v22 = vadd.f32 %v1672_v18, %v1671_v17  ;;  %v1684_v23 = vrot.slane %v1683_v19, 2 }
 0xc85   :  { %v1674_v24 = vrot.slane %v1673_v22, 1  ;;  %v1685_v21 = vadd.f32 %v1684_v23, %v1683_v19 }
 0xc87   :  { %v1675_v25 = vadd.f32 %v1674_v24, %v1673_v22  ;;  %v1686_v26 = vrot.slane %v1685_v21, 1 }
 0xc89   :  { %v1676_v27 = vmul.f32 0.0625, %v1675_v25  ;;  %v1687_v29 = vadd.f32 %v1686_v26, %v1685_v21 }
 0xc8b   :  { %v1688_v30 = vmul.f32 0.0625, %v1687_v29  ;;  %v1689_v31 = vmul.f32 %v1676_v27, %v1676_v27  ;;  %v1694_v39 = vsub.f32 %v1663_v2, %v1676_v27  ;;  %v1695_v40 = vsub.f32 %v1664_v7, %v1676_v27 }
 0xc8d   :  { %v1690_v32 = vsub.f32 %v1688_v30, %v1689_v31 }
 0xc8f   :  { %v1691_v33 = vadd.f32 1e-05, %v1690_v32 }
 0xc91   :  { %4228 = vrsqrt.f32 %v1691_v33 }
 0xc9e   :  { %v4229_v37 = vpop.eup %4228 }
 0xc9f   :  { %v1693_v38 = vmul.f32 %v4229_v37, %v1665_v36 }
 0xca1   :  { %v1699_v41 = vrot.slane %v1693_v38, %v4637_v28 }
 0xca3   :  { %v1700_v43 = vmul.f32 %v1699_v41, %v1694_v39  ;;  %v1701_v44 = vmul.f32 %v1699_v41, %v1695_v40  ;;  %v3721_v41 = vld [vmem:[%s4945_s11] ss:$0 sm:$0xff] }
 0xca5   :  { %v1708_v45 = vadd.f32 %v3710_v42, %v1700_v43  ;;  %v1709_v46 = vadd.f32 %v3710_v42, %v1701_v44 }
 0xca7   :  { %v1710_v47 = vpack.c.bf16 %v1709_v46, %v1708_v45 }
 0xca9   :  { %3995 = vmatmul.mubr.msk.bf16.vlgmr.msra.gmra.mxu1 %vm199_vm7, %v1710_v47  ;;  %v3727_v47 = vld [vmem:[%s4939_s5 + $0x1] ss:$0 sm:$0xff]  ;;  %s4958_s5 = smov 8  }
 0xcaa   :  { %4014 = vmatprep.mubr.msk.bf16.mxu1 %vm4292_vm4, %v4291_v8  ;;  %4011 = vmatpush3.bf16.msra.mxu1 %v4186_v59 }
 0xcab   :  { %4012 = vmatprep.subr.bf16.mxu1 %v4291_v8 }
 0xcae   :  { %4013 = vmatpush3.bf16.msra.mxu1 %v4187_v61 }
 0xcaf   :  { %4018 = vmatprep.subr.mxu1 %v4291_v8 }
 0xd69   :  { %v1771_v52 = vpop.f32.mrf.mxu1 }
 0xd6a   :  { %v1772_v54 = vadd.f32 %v3711_v51, %v1771_v52 }
 0xd6b   :  { %v3996_v53 = vpop.f32.mrf.mxu1 }
 0xd6c   :  { %v1778_v58 = vmax.f32 %v1772_v54, 0.0 }
 0xd6d   :  { %v1774_v55 = vpop.f32.mrf.mxu1 }
 0xd6e   :  { %v1775_v56 = vadd.f32 %v3711_v51, %v1774_v55 }
 0xd6f   :  { %v3997_v57 = vpop.f32.mrf.mxu1 }
 0xd70   :  { %v1779_v60 = vmax.f32 %v1775_v56, 0.0 }
 0xd72   :  { %v1780_v62 = vpack.c.bf16 %v1779_v60, %v1778_v58 }
 0xd74   :  { %4007 = vmatmul.mubr.msk.bf16.vlgmr.msra.gmra.mxu0 %vm1820_vm11, %v1780_v62 }
 0xd75   :  { %4030 = vmatprep.mubr.msk.f32.mxu0 %vm4292_vm4, %v4291_v8 }
 0xe34   :  { %v1858_v0 = vpop.f32.mrf.mxu0 }
 0xe35   :  { %v1859_v1 = vadd.f32 %v3715_v63, %v1858_v0 }
 0xe36   :  { %v4008_v2 = vpop.f32.mrf.mxu0 }
 0xe37   :  { %v1865_v3 = vadd.f32 %v1859_v1, %v1708_v45 }
 0xe38   :  { %v1861_v4 = vpop.f32.mrf.mxu0 }
 0xe39   :  { %v1862_v5 = vadd.f32 %v3715_v63, %v1861_v4  ;;  %v1879_v7 = vmul.f32 %v1865_v3, %v1865_v3  ;;  %v1869_v10 = vsel %vm199_vm7, %v1865_v3, 0.0 }
 0xe3a   :  { %v4009_v6 = vpop.f32.mrf.mxu0 }
 0xe3b   :  { %v1866_v9 = vadd.f32 %v1862_v5, %v1709_v46  ;;  %v1881_v14 = vsel %vm199_vm7, %v1879_v7, 0.0 }
 0xe3d   :  { %v1870_v11 = vsel %vm199_vm7, %v1866_v9, 0.0  ;;  %v1880_v12 = vmul.f32 %v1866_v9, %v1866_v9 }
 0xe3e   :  { %v1871_v13 = vadd.f32 %v1870_v11, %v1869_v10 }
 0xe3f   :  { %v1882_v15 = vsel %vm199_vm7, %v1880_v12, 0.0 }
 0xe40   :  { %v1872_v16 = vrot.slane %v1871_v13, 4  ;;  %v1883_v17 = vadd.f32 %v1882_v15, %v1881_v14 }
 0xe42   :  { %v1873_v20 = vadd.f32 %v1872_v16, %v1871_v13  ;;  %v1884_v18 = vrot.slane %v1883_v17, 4 }
 0xe44   :  { %v1874_v19 = vrot.slane %v1873_v20, 2  ;;  %v1885_v22 = vadd.f32 %v1884_v18, %v1883_v17 }
 0xe46   :  { %v1875_v23 = vadd.f32 %v1874_v19, %v1873_v20  ;;  %v1886_v24 = vrot.slane %v1885_v22, 2 }
 0xe48   :  { %v1876_v21 = vrot.slane %v1875_v23, 1  ;;  %v1887_v25 = vadd.f32 %v1886_v24, %v1885_v22 }
 0xe4a   :  { %v1877_v26 = vadd.f32 %v1876_v21, %v1875_v23  ;;  %v1888_v27 = vrot.slane %v1887_v25, 1 }
 0xe4c   :  { %v1878_v29 = vmul.f32 0.0625, %v1877_v26  ;;  %v1889_v30 = vadd.f32 %v1888_v27, %v1887_v25 }
 0xe4e   :  { %v1890_v31 = vmul.f32 0.0625, %v1889_v30  ;;  %v1891_v32 = vmul.f32 %v1878_v29, %v1878_v29  ;;  %v1896_v38 = vsub.f32 %v1865_v3, %v1878_v29  ;;  %v1897_v39 = vsub.f32 %v1866_v9, %v1878_v29 }
 0xe50   :  { %v1892_v33 = vsub.f32 %v1890_v31, %v1891_v32 }
 0xe52   :  { %v1893_v34 = vadd.f32 1e-05, %v1892_v33 }
 0xe54   :  { %4230 = vrsqrt.f32 %v1893_v34 }
 0xe61   :  { %v4231_v36 = vpop.eup %4230 }
 0xe62   :  { %v1895_v37 = vmul.f32 %v4231_v36, %v1867_v35 }
 0xe64   :  { %v1901_v40 = vrot.slane %v1895_v37, %v4637_v28 }
 0xe66   :  { %v1902_v42 = vmul.f32 %v1901_v40, %v1896_v38  ;;  %v1903_v43 = vmul.f32 %v1901_v40, %v1897_v39 }
 0xe68   :  { %v4686_v44 = vadd.f32 %v3721_v41, %v1902_v42  ;;  %v4688_v45 = vadd.f32 %v3721_v41, %v1903_v43 }
 0xe6a   :  { %v1912_v46 = vpack.c.bf16 %v4688_v45, %v4686_v44 }
 0xe6c   :  { %4015 = vmatmul.mubr.msk.bf16.vlgmr.msra.gmra.mxu1 %vm199_vm7, %v1912_v46 }
 0xe6d   :  { %4020 = vmatprep.mubr.msk.f32.mxu1 %vm4292_vm4, %v4291_v8 }
 0xf2c   :  { %v1975_v48 = vpop.f32.mrf.mxu1 }
 0xf2d   :  { %v4698_v49 = vadd.f32 %v3727_v47, %v1975_v48 }
 0xf2e   :  { %v4016_v50 = vpop.f32.mrf.mxu1 }
 0xf2f   :  { %1983 = vrot.lane.b32.xlu1 %v4698_v49, %s4293_s21 }
 0xf30   :  { %v1978_v51 = vpop.f32.mrf.mxu1 }
 0xf31   :  { %v4702_v52 = vadd.f32 %v3727_v47, %v1978_v51 }
 0xf32   :  { %v4017_v53 = vpop.f32.mrf.mxu1 }
 0xf33   :  { %2060 = vrot.lane.b32.xlu0 %v4702_v52, %s4293_s21  ;;  %s4959_s21 = smov 16  }
 0xfa1   :  { %v1984_v54 = vpop.permute.xlu1 %1983 }
 0xfa2   :  { %4019 = vmatpush3.xpose.msk.msra.mxu1 %vm247_vm8, %v1984_v54 }
 0xfa3   :  { %4023 = vmatprep.subr.mxu1 %v4291_v8 }
 0xfa5   :  { %4021 = vmatmul.mubr.msk.f32.vlgmr.msra.gmra.mxu1 %vm247_vm8, %v4698_v49  ;;  %v2061_v55 = vpop.permute.xlu0 %2060 }
 0xfa6   :  { %4024 = vmatpush3.xpose.msk.msra.mxu1 %vm247_vm8, %v2061_v55  ;;  %4025 = vmatprep.mubr.msk.f32.mxu1 %vm4292_vm4, %v4291_v8 }
 0xfa7   :  { %4033 = vmatprep.subr.mxu1 %v4291_v8 }
 0xfa9   :  { %4026 = vmatmul.mubr.msk.f32.vlgmr.msra.gmra.mxu1 %vm247_vm8, %v4702_v52 }
 0xfaa   :  { %4035 = vmatprep.mubr.msk.f32.mxu1 %vm4292_vm4, %v4291_v8 }
0x1065   :  { %v2055_v56 = vpop.f32.mrf.mxu1 }
0x1066   :  { %v2136_v57 = vsel %vm247_vm8, %v2055_v56, -inf }
0x1067   :  { %2137 = vmax.xlane.f32.xlu1 %v2136_v57  ;;  %v4022_v58 = vpop.f32.mrf.mxu1 }
0x1069   :  { %v2132_v60 = vpop.f32.mrf.mxu1 }
0x106a   :  { %v2139_v62 = vsel %vm247_vm8, %v2132_v60, -inf }
0x106b   :  { %2140 = vmax.xlane.f32.xlu0 %v2139_v62  ;;  %v4027_v59 = vpop.f32.mrf.mxu1 }
0x1078   :  { %2234 = vrot.lane.b32.xlu1 %v4702_v52, %s4294_s23 }
0x107c   :  { %2312 = vrot.lane.b32.xlu1 %v4698_v49, %s4295_s24 }
0x1081   :  { %2158 = vrot.lane.b32.xlu0 %v4698_v49, %s4294_s23 }
0x10f0   :  { %v2138_v61 = vpop.xlane.xlu1 %2137 }
0x10f1   :  { %v2142_v63 = vsub.f32 %v2055_v56, %v2138_v61 }
0x10f3   :  { %v2144_v0 = vmul.f32 1.442695, %v2142_v63 }
0x10f4   :  { %v2235_v1 = vpop.permute.xlu1 %2234  ;;  %v2141_v2 = vpop.xlane.xlu0 %2140 }
0x10f5   :  { %4232 = vpow2.f32 %v2144_v0  ;;  %v2143_v3 = vsub.f32 %v2132_v60, %v2141_v2  ;;  %4034 = vmatpush3.msra.mxu1 %v2235_v1 }
0x10f6   :  { %4043 = vmatprep.subr.mxu1 %v4291_v8 }
0x10f7   :  { %v2146_v4 = vmul.f32 1.442695, %v2143_v3 }
0x10f8   :  { %v2159_v5 = vpop.permute.xlu0 %2158  ;;  %v2313_v11 = vpop.permute.xlu1 %2312 }
0x10f9   :  { %4234 = vpow2.f32 %v2146_v4  ;;  %4029 = vmatpush3.msra.mxu0 %v2159_v5 }
0x10fa   :  { %4038 = vmatprep.subr.mxu0 %v4291_v8 }
0x1102   :  { %v4233_v6 = vpop.eup %4232 }
0x1103   :  { %v2148_v7 = vsel %vm247_vm8, %v4233_v6, 0.0 }
0x1104   :  { %2149 = vadd.xlane.f32.xlu0 %v2148_v7 }
0x1106   :  { %v4235_v9 = vpop.eup %4234 }
0x1107   :  { %v2151_v10 = vsel %vm247_vm8, %v4235_v9, 0.0 }
0x1108   :  { %2152 = vadd.xlane.f32.xlu1 %v2151_v10 }
0x1119   :  { %2310 = vrot.lane.b32.xlu1 %v4698_v49, %s4296_s25 }
0x111a   :  { %2390 = vrot.lane.b32.xlu0 %v4702_v52, %s4295_s24 }
0x111e   :  { %2388 = vrot.lane.b32.xlu0 %v4702_v52, %s4296_s25 }
0x118d   :  { %v2150_v12 = vpop.xlane.xlu0 %2149 }
0x118e   :  { %4236 = vrcp.f32 %v2150_v12 }
0x1191   :  { %v2153_v13 = vpop.xlane.xlu1 %2152  ;;  %v2391_v17 = vpop.permute.xlu0 %2390 }
0x1192   :  { %4238 = vrcp.f32 %v2153_v13 }
0x1195   :  { %v2311_v18 = vpop.permute.xlu1 %2310  ;;  %v2389_v19 = vpop.permute.xlu0 %2388 }
0x119b   :  { %v4237_v14 = vpop.eup %4236 }
0x119c   :  { %v2156_v15 = vmul.f32 %v4237_v14, %v4233_v6 }
0x119e   :  { %4031 = vmatmul.mubr.msk.f32.vlgmr.msra.gmra.mxu0 %vm247_vm8, %v2156_v15 }
0x119f   :  { %v4239_v16 = vpop.eup %4238  ;;  %4039 = vmatpush3.xpose.msk.msra.mxu0 %vm247_vm8, %v2313_v11  ;;  %4040 = vmatprep.mubr.msk.f32.mxu0 %vm4292_vm4, %v4291_v8 }
0x11a0   :  { %v2157_v20 = vmul.f32 %v4239_v16, %v4235_v9  ;;  %4048 = vmatprep.subr.mxu0 %v4291_v8 }
0x11a2   :  { %4036 = vmatmul.mubr.msk.f32.vlgmr.msra.gmra.mxu1 %vm247_vm8, %v2157_v20  ;;  %4041 = vmatmul.mubr.msk.f32.vlgmr.msra.gmra.mxu0 %vm247_vm8, %v2311_v18 }
0x11a3   :  { %4044 = vmatpush3.xpose.msk.msra.mxu1 %vm247_vm8, %v2391_v17  ;;  %4045 = vmatprep.mubr.msk.f32.mxu1 %vm4292_vm4, %v4291_v8 }
0x11a4   :  { %4053 = vmatprep.subr.mxu1 %v4291_v8  ;;  %4050 = vmatprep.mubr.msk.f32.mxu0 %vm4292_vm4, %v4291_v8 }
0x11a6   :  { %4046 = vmatmul.mubr.msk.f32.vlgmr.msra.gmra.mxu1 %vm247_vm8, %v2389_v19 }
0x11a7   :  { %4055 = vmatprep.mubr.msk.f32.mxu1 %vm4292_vm4, %v4291_v8 }
0x125e   :  { %v4752_v22 = vpop.f32.mrf.mxu0 }
0x1260   :  { %v4032_v23 = vpop.f32.mrf.mxu0 }
0x1262   :  { %v4754_v24 = vpop.f32.mrf.mxu1  ;;  %v2384_v21 = vpop.f32.mrf.mxu0 }
0x1263   :  { %v2466_v25 = vsel %vm247_vm8, %v2384_v21, -inf }
0x1264   :  { %2467 = vmax.xlane.f32.xlu1 %v2466_v25  ;;  %v4037_v26 = vpop.f32.mrf.mxu1  ;;  %v4042_v27 = vpop.f32.mrf.mxu0 }
0x1266   :  { %v2462_v29 = vpop.f32.mrf.mxu1 }
0x1267   :  { %v2469_v30 = vsel %vm247_vm8, %v2462_v29, -inf }
0x1268   :  { %2470 = vmax.xlane.f32.xlu0 %v2469_v30  ;;  %v4047_v31 = vpop.f32.mrf.mxu1 }
0x1275   :  { %2564 = vrot.lane.b32.xlu1 %v4702_v52, %s4297_s26 }
0x1279   :  { %2642 = vrot.lane.b32.xlu1 %v4698_v49, %s4298_s27 }
0x127e   :  { %2488 = vrot.lane.b32.xlu0 %v4698_v49, %s4297_s26 }
0x12ed   :  { %v2468_v32 = vpop.xlane.xlu1 %2467 }
0x12ee   :  { %v2472_v33 = vsub.f32 %v2384_v21, %v2468_v32 }
0x12f0   :  { %v2474_v34 = vmul.f32 1.442695, %v2472_v33 }
0x12f1   :  { %v2565_v35 = vpop.permute.xlu1 %2564  ;;  %v2471_v36 = vpop.xlane.xlu0 %2470 }
0x12f2   :  { %4240 = vpow2.f32 %v2474_v34  ;;  %v2473_v37 = vsub.f32 %v2462_v29, %v2471_v36  ;;  %4054 = vmatpush3.msra.mxu1 %v2565_v35 }
0x12f3   :  { %4063 = vmatprep.subr.mxu1 %v4291_v8 }
0x12f4   :  { %v2476_v38 = vmul.f32 1.442695, %v2473_v37 }
0x12f5   :  { %v2489_v39 = vpop.permute.xlu0 %2488  ;;  %v2643_v46 = vpop.permute.xlu1 %2642 }
0x12f6   :  { %4242 = vpow2.f32 %v2476_v38  ;;  %4049 = vmatpush3.msra.mxu0 %v2489_v39 }
0x12f7   :  { %4058 = vmatprep.subr.mxu0 %v4291_v8 }
0x12ff   :  { %v4241_v40 = vpop.eup %4240 }
0x1300   :  { %v2478_v41 = vsel %vm247_vm8, %v4241_v40, 0.0 }
0x1301   :  { %2479 = vadd.xlane.f32.xlu0 %v2478_v41 }
0x1303   :  { %v4243_v42 = vpop.eup %4242 }
0x1304   :  { %v2481_v43 = vsel %vm247_vm8, %v4243_v42, 0.0 }
0x1305   :  { %2482 = vadd.xlane.f32.xlu1 %v2481_v43 }
0x1316   :  { %2640 = vrot.lane.b32.xlu1 %v4698_v49, %s4299_s28 }
0x1317   :  { %2720 = vrot.lane.b32.xlu0 %v4702_v52, %s4298_s27  ;;  %s4960_s27 = smov 24  }
0x131b   :  { %2718 = vrot.lane.b32.xlu0 %v4702_v52, %s4299_s28 }
0x138a   :  { %v2480_v47 = vpop.xlane.xlu0 %2479 }
0x138b   :  { %4244 = vrcp.f32 %v2480_v47 }
0x138e   :  { %v2483_v48 = vpop.xlane.xlu1 %2482  ;;  %v2721_v54 = vpop.permute.xlu0 %2720 }
0x138f   :  { %4246 = vrcp.f32 %v2483_v48 }
0x1392   :  { %v2641_v56 = vpop.permute.xlu1 %2640  ;;  %v2719_v57 = vpop.permute.xlu0 %2718 }
0x1398   :  { %v4245_v50 = vpop.eup %4244 }
0x1399   :  { %v2486_v51 = vmul.f32 %v4245_v50, %v4241_v40 }
0x139b   :  { %4051 = vmatmul.mubr.msk.f32.vlgmr.msra.gmra.mxu0 %vm247_vm8, %v2486_v51 }
0x139c   :  { %v4247_v53 = vpop.eup %4246  ;;  %4059 = vmatpush3.xpose.msk.msra.mxu0 %vm247_vm8, %v2643_v46  ;;  %4060 = vmatprep.mubr.msk.f32.mxu0 %vm4292_vm4, %v4291_v8 }
0x139d   :  { %v2487_v55 = vmul.f32 %v4247_v53, %v4243_v42  ;;  %4068 = vmatprep.subr.mxu0 %v4291_v8 }
0x139f   :  { %4056 = vmatmul.mubr.msk.f32.vlgmr.msra.gmra.mxu1 %vm247_vm8, %v2487_v55  ;;  %4061 = vmatmul.mubr.msk.f32.vlgmr.msra.gmra.mxu0 %vm247_vm8, %v2641_v56 }
0x13a0   :  { %4064 = vmatpush3.xpose.msk.msra.mxu1 %vm247_vm8, %v2721_v54  ;;  %4065 = vmatprep.mubr.msk.f32.mxu1 %vm4292_vm4, %v4291_v8 }
0x13a1   :  { %4073 = vmatprep.subr.mxu1 %v4291_v8  ;;  %4070 = vmatprep.mubr.msk.f32.mxu0 %vm4292_vm4, %v4291_v8 }
0x13a3   :  { %4066 = vmatmul.mubr.msk.f32.vlgmr.msra.gmra.mxu1 %vm247_vm8, %v2719_v57 }
0x13a4   :  { %4075 = vmatprep.mubr.msk.f32.mxu1 %vm4292_vm4, %v4291_v8 }
0x145b   :  { %v4790_v58 = vpop.f32.mrf.mxu0 }
0x145d   :  { %v4052_v60 = vpop.f32.mrf.mxu0 }
0x145f   :  { %v4792_v62 = vpop.f32.mrf.mxu1  ;;  %v2714_v59 = vpop.f32.mrf.mxu0 }
0x1460   :  { %v4161_v61 = vpack.i.bf16 %v4792_v62, %v4790_v58  ;;  %v2796_v63 = vsel %vm247_vm8, %v2714_v59, -inf }
0x1461   :  { %2797 = vmax.xlane.f32.xlu1 %v2796_v63  ;;  %v4057_v0 = vpop.f32.mrf.mxu1  ;;  %v4062_v1 = vpop.f32.mrf.mxu0  ;;  %v4189_v63 = vld [vmem:[%s4940_s6 + $0x10] sm:$0xff]  }
0x1463   :  { %v2792_v2 = vpop.f32.mrf.mxu1 }
0x1464   :  { %v2799_v3 = vsel %vm247_vm8, %v2792_v2, -inf }
0x1465   :  { %2800 = vmax.xlane.f32.xlu0 %v2799_v3  ;;  %v4067_v4 = vpop.f32.mrf.mxu1 }
0x1472   :  { %2894 = vrot.lane.b32.xlu1 %v4702_v52, %s4300_s29 }
0x1476   :  { %2972 = vrot.lane.b32.xlu1 %v4698_v49, %s4301_s30 }
0x147b   :  { %2818 = vrot.lane.b32.xlu0 %v4698_v49, %s4300_s29 }
0x14ea   :  { %v2798_v5 = vpop.xlane.xlu1 %2797 }
0x14eb   :  { %v2802_v6 = vsub.f32 %v2714_v59, %v2798_v5 }
0x14ed   :  { %v2804_v7 = vmul.f32 1.442695, %v2802_v6 }
0x14ee   :  { %v2895_v9 = vpop.permute.xlu1 %2894  ;;  %v2801_v10 = vpop.xlane.xlu0 %2800 }
0x14ef   :  { %4248 = vpow2.f32 %v2804_v7  ;;  %v2803_v11 = vsub.f32 %v2792_v2, %v2801_v10  ;;  %4074 = vmatpush3.msra.mxu1 %v2895_v9 }
0x14f0   :  { %4083 = vmatprep.subr.mxu1 %v4291_v8 }
0x14f1   :  { %v2806_v12 = vmul.f32 1.442695, %v2803_v11 }
0x14f2   :  { %v2819_v13 = vpop.permute.xlu0 %2818  ;;  %v2973_v20 = vpop.permute.xlu1 %2972 }
0x14f3   :  { %4250 = vpow2.f32 %v2806_v12  ;;  %4069 = vmatpush3.msra.mxu0 %v2819_v13 }
0x14f4   :  { %4078 = vmatprep.subr.mxu0 %v4291_v8 }
0x14fc   :  { %v4249_v14 = vpop.eup %4248 }
0x14fd   :  { %v2808_v15 = vsel %vm247_vm8, %v4249_v14, 0.0 }
0x14fe   :  { %2809 = vadd.xlane.f32.xlu0 %v2808_v15 }
0x1500   :  { %v4251_v16 = vpop.eup %4250 }
0x1501   :  { %v2811_v17 = vsel %vm247_vm8, %v4251_v16, 0.0 }
0x1502   :  { %2812 = vadd.xlane.f32.xlu1 %v2811_v17 }
0x1513   :  { %2970 = vrot.lane.b32.xlu1 %v4698_v49, %s4302_s0 }
0x1514   :  { %3050 = vrot.lane.b32.xlu0 %v4702_v52, %s4301_s30 }
0x1518   :  { %3048 = vrot.lane.b32.xlu0 %v4702_v52, %s4302_s0 }
0x1587   :  { %v2810_v18 = vpop.xlane.xlu0 %2809 }
0x1588   :  { %4252 = vrcp.f32 %v2810_v18 }
0x158b   :  { %v2813_v19 = vpop.xlane.xlu1 %2812  ;;  %v3051_v26 = vpop.permute.xlu0 %3050 }
0x158c   :  { %4254 = vrcp.f32 %v2813_v19 }
0x158f   :  { %v2971_v29 = vpop.permute.xlu1 %2970  ;;  %v3049_v30 = vpop.permute.xlu0 %3048 }
0x1595   :  { %v4253_v23 = vpop.eup %4252 }
0x1596   :  { %v2816_v21 = vmul.f32 %v4253_v23, %v4249_v14 }
0x1598   :  { %4071 = vmatmul.mubr.msk.f32.vlgmr.msra.gmra.mxu0 %vm247_vm8, %v2816_v21  ;;  %v4192_v21 = vld [vmem:[%s4948_s14 + $0x38] sm:$0xff]  }
0x1599   :  { %v4255_v25 = vpop.eup %4254  ;;  %4079 = vmatpush3.xpose.msk.msra.mxu0 %vm247_vm8, %v2973_v20  ;;  %4080 = vmatprep.mubr.msk.f32.mxu0 %vm4292_vm4, %v4291_v8 }
0x159a   :  { %v2817_v27 = vmul.f32 %v4255_v25, %v4251_v16  ;;  %4088 = vmatprep.subr.mxu0 %v4291_v8  ;;  %v3760_v25 = vld [vmem:[%s4941_s7 + $0x1] ss:$0 sm:$0xff] }
0x159c   :  { %4076 = vmatmul.mubr.msk.f32.vlgmr.msra.gmra.mxu1 %vm247_vm8, %v2817_v27  ;;  %4081 = vmatmul.mubr.msk.f32.vlgmr.msra.gmra.mxu0 %vm247_vm8, %v2971_v29 }
0x159d   :  { %4084 = vmatpush3.xpose.msk.msra.mxu1 %vm247_vm8, %v3051_v26  ;;  %4085 = vmatprep.mubr.msk.f32.mxu1 %vm4292_vm4, %v4291_v8 }
0x159e   :  { %4093 = vmatprep.subr.mxu1 %v4291_v8  ;;  %4090 = vmatprep.mubr.msk.f32.mxu0 %vm4292_vm4, %v4291_v8 }
0x15a0   :  { %4086 = vmatmul.mubr.msk.f32.vlgmr.msra.gmra.mxu1 %vm247_vm8, %v3049_v30 }
0x15a1   :  { %4095 = vmatprep.mubr.msk.f32.mxu1 %vm4292_vm4, %v4291_v8 }
0x1658   :  { %v2890_v31 = vpop.f32.mrf.mxu0 }
0x165a   :  { %v4072_v32 = vpop.f32.mrf.mxu0 }
0x165c   :  { %v2966_v33 = vpop.f32.mrf.mxu1  ;;  %v3044_v34 = vpop.f32.mrf.mxu0 }
0x165d   :  { %v4166_v35 = vpack.i.bf16 %v2966_v33, %v2890_v31  ;;  %v3126_v36 = vsel %vm247_vm8, %v3044_v34, -inf }
0x165e   :  { %3127 = vmax.xlane.f32.xlu1 %v3126_v36  ;;  %v4077_v37 = vpop.f32.mrf.mxu1  ;;  %v4082_v38 = vpop.f32.mrf.mxu0 }
0x1660   :  { %v3122_v39 = vpop.f32.mrf.mxu1 }
0x1661   :  { %v3129_v40 = vsel %vm247_vm8, %v3122_v39, -inf }
0x1662   :  { %3130 = vmax.xlane.f32.xlu0 %v3129_v40  ;;  %v4087_v41 = vpop.f32.mrf.mxu1 }
0x16e7   :  { %v3128_v42 = vpop.xlane.xlu1 %3127 }
0x16e8   :  { %v3132_v43 = vsub.f32 %v3044_v34, %v3128_v42 }
0x16ea   :  { %v3134_v46 = vmul.f32 1.442695, %v3132_v43 }
0x16eb   :  { %v3131_v47 = vpop.xlane.xlu0 %3130 }
0x16ec   :  { %4256 = vpow2.f32 %v3134_v46  ;;  %v3133_v48 = vsub.f32 %v3122_v39, %v3131_v47 }
0x16ee   :  { %v3136_v50 = vmul.f32 1.442695, %v3133_v48 }
0x16f0   :  { %4258 = vpow2.f32 %v3136_v50 }
0x16f9   :  { %v4257_v51 = vpop.eup %4256 }
0x16fa   :  { %v3138_v53 = vsel %vm247_vm8, %v4257_v51, 0.0 }
0x16fb   :  { %3139 = vadd.xlane.f32.xlu0 %v3138_v53 }
0x16fd   :  { %v4259_v54 = vpop.eup %4258 }
0x16fe   :  { %v3141_v55 = vsel %vm247_vm8, %v4259_v54, 0.0 }
0x16ff   :  { %3142 = vadd.xlane.f32.xlu1 %v3141_v55 }
0x1710   :  { %3224 = vrot.lane.b32.xlu1 %v4702_v52, %s4303_s2 }
0x1711   :  { %3148 = vrot.lane.b32.xlu0 %v4698_v49, %s4303_s2 }
0x1714   :  { %4162 = vrot.lane.b32.xlu1 %v4161_v61, %s4958_s5  ;;  %v4188_v61 = vld [vmem:[%s4940_s6 + $0x18] sm:$0xff]  }
0x1715   :  { %4167 = vrot.lane.b32.xlu0 %v4166_v35, %s4959_s21 }
0x1784   :  { %v3140_v56 = vpop.xlane.xlu0 %3139 }
0x1785   :  { %4260 = vrcp.f32 %v3140_v56 }
0x1788   :  { %v3143_v57 = vpop.xlane.xlu1 %3142  ;;  %v3149_v60 = vpop.permute.xlu0 %3148 }
0x1789   :  { %4262 = vrcp.f32 %v3143_v57  ;;  %4089 = vmatpush3.msra.mxu0 %v3149_v60 }
0x178a   :  { %4098 = vmatprep.subr.bf16.mxu0 %v4291_v8 }
0x178c   :  { %v3225_v59 = vpop.permute.xlu1 %3224  ;;  %v4168_v9 = vpop.permute.xlu0 %4167 }
0x178d   :  { %4094 = vmatpush3.msra.mxu1 %v3225_v59  ;;  %v4170_v12 = vunpack.i.h.bf16 %v4168_v9  ;;  %v4169_v13 = vunpack.i.l.bf16 %v4168_v9  ;;  %v4193_v9 = vld [vmem:[%s4948_s14 + $0x30] sm:$0xff]  }
0x178e   :  { %4106 = vmatprep.subr.bf16.mxu1 %v4291_v8 }
0x1790   :  { %v4163_v5 = vpop.permute.xlu1 %4162 }
0x1791   :  { %v4165_v6 = vunpack.i.h.bf16 %v4163_v5  ;;  %v4164_v7 = vunpack.i.l.bf16 %v4163_v5 }
0x1792   :  { %v4261_v49 = vpop.eup %4260 }
0x1793   :  { %v3146_v52 = vmul.f32 %v4261_v49, %v4257_v51  ;;  %v3325_v10 = vsel %vm247_vm8, %v4754_v24, %v4165_v6  ;;  %v3324_v11 = vsel %vm247_vm8, %v4752_v22, %v4164_v7  ;;  %v4190_v22 = vld [vmem:[%s4946_s12 + $0x18] sm:$0xff]   ;;  %v4191_v24 = vld [vmem:[%s4946_s12 + $0x10] sm:$0xff]  }
0x1794   :  { %v3326_v17 = vsel %vm1589_vm9, %v3324_v11, %v4169_v13  ;;  %v3327_v20 = vsel %vm1589_vm9, %v3325_v10, %v4170_v12  ;;  %v4194_v10 = vld [vmem:[%s4948_s14 + $0x28] sm:$0xff]   ;;  %v4195_v11 = vld [vmem:[%s4948_s14 + $0x20] sm:$0xff]  }
0x1795   :  { %4091 = vmatmul.mubr.msk.f32.vlgmr.msra.gmra.mxu0 %vm247_vm8, %v3146_v52  ;;  %v3772_v12 = vld [vmem:[%s4947_s13 + $0x1] ss:$0 sm:$0xff] }
0x1796   :  { %v4263_v58 = vpop.eup %4262  ;;  %4102 = vmatprep.mubr.msk.bf16.mxu0 %vm4292_vm4, %v4291_v8  ;;  %4099 = vmatpush3.bf16.msra.mxu0 %v4188_v61 }
0x1797   :  { %v3147_v62 = vmul.f32 %v4263_v58, %v4259_v54  ;;  %4100 = vmatprep.subr.bf16.mxu0 %v4291_v8  ;;  %v3764_v58 = vld [vmem:[%s4942_s8 + $0x1] sm:$0x1] }
0x1799   :  { %4096 = vmatmul.mubr.msk.f32.vlgmr.msra.gmra.mxu1 %vm247_vm8, %v3147_v62 }
0x179a   :  { %4110 = vmatprep.mubr.msk.bf16.mxu1 %vm4292_vm4, %v4291_v8  ;;  %4101 = vmatpush3.bf16.msra.mxu0 %v4189_v63 }
0x179b   :  { %4114 = vmatprep.subr.bf16.mxu0 %v4291_v8  ;;  %4107 = vmatpush3.bf16.msra.mxu1 %v4190_v22 }
0x179c   :  { %4108 = vmatprep.subr.bf16.mxu1 %v4291_v8 }
0x179f   :  { %4109 = vmatpush3.bf16.msra.mxu1 %v4191_v24 }
0x1855   :  { %v3220_v0 = vpop.f32.mrf.mxu0 }
0x1857   :  { %v4092_v1 = vpop.f32.mrf.mxu0 }
0x1859   :  { %v3296_v2 = vpop.f32.mrf.mxu1 }
0x185a   :  { %v4171_v3 = vpack.i.bf16 %v3296_v2, %v3220_v0  ;;  %v3766_v2 = vld [vmem:[%s4943_s9 + $0x1] ss:$0 sm:$0xff] }
0x185b   :  { %v4097_v4 = vpop.f32.mrf.mxu1 }
0x185c   :  { %4172 = vrot.lane.b32.xlu1 %v4171_v3, %s4960_s27  ;;  %s4307_s27 = smov [#allocation2]  }
0x185d   :  { %s3663_s6 = sshll.u32 %s4307_s27, 4  ;;  %s3664_s6 = int_to_ptr.vmem [resolvable:$true] %s3663_s6 }
0x185e   :  { %p4273_p1 = scmp.lt.s32.totalorder %s3664_s6, %s3664_s6 }
0x18ce   :  { %v4173_v14 = vpop.permute.xlu1 %4172 }
0x18cf   :  { %v4175_v15 = vunpack.i.h.bf16 %v4173_v14  ;;  %v4174_v16 = vunpack.i.l.bf16 %v4173_v14 }
0x18d1   :  { %v3329_v18 = vsel %vm1592_vm10, %v3327_v20, %v4175_v15  ;;  %v3328_v19 = vsel %vm1592_vm10, %v3326_v17, %v4174_v16 }
0x18d2   :  { %v3330_v23 = vpack.c.bf16 %v3329_v18, %v3328_v19 }
0x18d4   :  { %4103 = vmatmul.mubr.msk.bf16.vlgmr.msra.gmra.mxu0 %vm199_vm7, %v3330_v23 }
0x18d5   :  { %4122 = vmatprep.mubr.msk.bf16.mxu0 %vm4292_vm4, %v4291_v8  ;;  %4115 = vmatpush3.bf16.msra.mxu0 %v4192_v21 }
0x18d6   :  { %4116 = vmatprep.subr.bf16.mxu0 %v4291_v8 }
0x18d9   :  { %4117 = vmatpush3.bf16.msra.mxu0 %v4193_v9 }
0x18da   :  { %4118 = vmatprep.subr.bf16.mxu0 %v4291_v8 }
0x18dd   :  { %4119 = vmatpush3.bf16.msra.mxu0 %v4194_v10 }
0x18de   :  { %4120 = vmatprep.subr.bf16.mxu0 %v4291_v8  ;;  %v3785_v8 = vld [vmem:[%s4949_s15 + $0x1] ss:$0 sm:$0xff] }
0x18e1   :  { %4121 = vmatpush3.bf16.msra.mxu0 %v4195_v11 }
0x1994   :  { %v3393_v26 = vpop.f32.mrf.mxu0 }
0x1995   :  { %v3394_v27 = vadd.f32 %v3760_v25, %v3393_v26 }
0x1996   :  { %v4104_v29 = vpop.f32.mrf.mxu0 }
0x1997   :  { %v3400_v30 = vadd.f32 %v3394_v27, %v4686_v44 }
0x1998   :  { %v3396_v31 = vpop.f32.mrf.mxu0 }
0x1999   :  { %v3397_v32 = vadd.f32 %v3760_v25, %v3396_v31  ;;  %v3416_v34 = vmul.f32 %v3400_v30, %v3400_v30  ;;  %v3406_v36 = vsel %vm199_vm7, %v3400_v30, 0.0 }
0x199a   :  { %v4105_v33 = vpop.f32.mrf.mxu0 }
0x199b   :  { %v3401_v35 = vadd.f32 %v3397_v32, %v4688_v45  ;;  %v3418_v40 = vsel %vm199_vm7, %v3416_v34, 0.0 }
0x199d   :  { %v3407_v37 = vsel %vm199_vm7, %v3401_v35, 0.0  ;;  %v3417_v38 = vmul.f32 %v3401_v35, %v3401_v35 }
0x199e   :  { %v3408_v39 = vadd.f32 %v3407_v37, %v3406_v36 }
0x199f   :  { %v3419_v41 = vsel %vm199_vm7, %v3417_v38, 0.0 }
0x19a0   :  { %v3409_v42 = vrot.slane %v3408_v39, 4  ;;  %v3420_v43 = vadd.f32 %v3419_v41, %v3418_v40 }
0x19a2   :  { %v3410_v46 = vadd.f32 %v3409_v42, %v3408_v39  ;;  %v3421_v44 = vrot.slane %v3420_v43, 4 }
0x19a4   :  { %v3411_v47 = vrot.slane %v3410_v46, 2  ;;  %v3422_v48 = vadd.f32 %v3421_v44, %v3420_v43 }
0x19a6   :  { %v3412_v50 = vadd.f32 %v3411_v47, %v3410_v46  ;;  %v3423_v51 = vrot.slane %v3422_v48, 2 }
0x19a8   :  { %v3413_v53 = vrot.slane %v3412_v50, 1  ;;  %v3424_v45 = vadd.f32 %v3423_v51, %v3422_v48 }
0x19aa   :  { %v3414_v54 = vadd.f32 %v3413_v53, %v3412_v50  ;;  %v3425_v55 = vrot.slane %v3424_v45, 1 }
0x19ac   :  { %v3415_v56 = vmul.f32 0.0625, %v3414_v54  ;;  %v3426_v57 = vadd.f32 %v3425_v55, %v3424_v45 }
0x19ae   :  { %v3427_v60 = vmul.f32 0.0625, %v3426_v57  ;;  %v3428_v59 = vmul.f32 %v3415_v56, %v3415_v56  ;;  %v3433_v63 = vsub.f32 %v3400_v30, %v3415_v56  ;;  %v3434_v0 = vsub.f32 %v3401_v35, %v3415_v56 }
0x19b0   :  { %v3429_v49 = vsub.f32 %v3427_v60, %v3428_v59  ;;  %v3791_v60 = vld [vmem:[%s4944_s10 + $0x1] sm:$0x1]  ;;  %s4268_s10 = scalar_lea.vmem %s3664_s6, 256 }
0x19b1   :  { %p4269_p0 = scmp.ne.s32.totalorder %s3664_s6, %s4268_s10  ;;  %p4274_p2 = scmp.lt.s32.totalorder %s4268_s10, %s4268_s10 }
0x19b2   :  { %v3430_v52 = vadd.f32 1e-05, %v3429_v49 }
0x19b3   :  { %p4275_p3 = por %p4274_p2, %p4273_p1 }
0x19b4   :  { %4264 = vrsqrt.f32 %v3430_v52 }
0x19b5   :  { %p4276_p4 = pnand %p4275_p3, %p4269_p0 }
0x19c1   :  { %v4265_v62 = vpop.eup %4264 }
0x19c2   :  { %v3432_v61 = vmul.f32 %v4265_v62, %v3764_v58 }
0x19c4   :  { %v3438_v1 = vrot.slane %v3432_v61, %v4637_v28  ;;  %v3793_v61 = vld [vmem:[%s4945_s11 + $0x1] ss:$0 sm:$0xff] }
0x19c6   :  { %v3439_v3 = vmul.f32 %v3438_v1, %v3433_v63  ;;  %v3440_v4 = vmul.f32 %v3438_v1, %v3434_v0 }
0x19c8   :  { %v3447_v5 = vadd.f32 %v3766_v2, %v3439_v3  ;;  %v3448_v6 = vadd.f32 %v3766_v2, %v3440_v4 }
0x19ca   :  { %v3449_v7 = vpack.c.bf16 %v3448_v6, %v3447_v5 }
0x19cc   :  { %4111 = vmatmul.mubr.msk.bf16.vlgmr.msra.gmra.mxu1 %vm199_vm7, %v3449_v7 }
0x1a8c   :  { %v3512_v13 = vpop.f32.mrf.mxu1 }
0x1a8d   :  { %v3513_v15 = vadd.f32 %v3772_v12, %v3512_v13 }
0x1a8e   :  { %v4112_v14 = vpop.f32.mrf.mxu1 }
0x1a8f   :  { %v3519_v18 = vmax.f32 %v3513_v15, 0.0 }
0x1a90   :  { %v3515_v16 = vpop.f32.mrf.mxu1 }
0x1a91   :  { %v3516_v17 = vadd.f32 %v3772_v12, %v3515_v16 }
0x1a92   :  { %v4113_v20 = vpop.f32.mrf.mxu1 }
0x1a93   :  { %v3520_v19 = vmax.f32 %v3516_v17, 0.0 }
0x1a95   :  { %v3521_v23 = vpack.c.bf16 %v3520_v19, %v3519_v18 }
0x1a97   :  { %4123 = vmatmul.mubr.msk.bf16.vlgmr.msra.gmra.mxu0 %vm1820_vm11, %v3521_v23 }
0x1b57   :  { %v3600_v22 = vpop.f32.mrf.mxu0 }
0x1b58   :  { %v3601_v24 = vadd.f32 %v3785_v8, %v3600_v22 }
0x1b59   :  { %v4124_v21 = vpop.f32.mrf.mxu0 }
0x1b5a   :  { %v3607_v25 = vadd.f32 %v3601_v24, %v3447_v5 }
0x1b5b   :  { %v3603_v26 = vpop.f32.mrf.mxu0 }
0x1b5c   :  { %v3604_v27 = vadd.f32 %v3785_v8, %v3603_v26  ;;  %v3623_v30 = vmul.f32 %v3607_v25, %v3607_v25  ;;  %v3613_v32 = vsel %vm199_vm7, %v3607_v25, 0.0 }
0x1b5d   :  { %v4125_v29 = vpop.f32.mrf.mxu0 }
0x1b5e   :  { %v3608_v31 = vadd.f32 %v3604_v27, %v3448_v6  ;;  %v3625_v36 = vsel %vm199_vm7, %v3623_v30, 0.0 }
0x1b60   :  { %v3614_v33 = vsel %vm199_vm7, %v3608_v31, 0.0  ;;  %v3624_v34 = vmul.f32 %v3608_v31, %v3608_v31 }
0x1b61   :  { %v3615_v35 = vadd.f32 %v3614_v33, %v3613_v32 }
0x1b62   :  { %v3626_v37 = vsel %vm199_vm7, %v3624_v34, 0.0 }
0x1b63   :  { %v3616_v38 = vrot.slane %v3615_v35, 4  ;;  %v3627_v39 = vadd.f32 %v3626_v37, %v3625_v36 }
0x1b65   :  { %v3617_v40 = vadd.f32 %v3616_v38, %v3615_v35  ;;  %v3628_v41 = vrot.slane %v3627_v39, 4 }
0x1b67   :  { %v3618_v42 = vrot.slane %v3617_v40, 2  ;;  %v3629_v43 = vadd.f32 %v3628_v41, %v3627_v39 }
0x1b69   :  { %v3619_v46 = vadd.f32 %v3618_v42, %v3617_v40  ;;  %v3630_v44 = vrot.slane %v3629_v43, 2 }
0x1b6b   :  { %v3620_v47 = vrot.slane %v3619_v46, 1  ;;  %v3631_v48 = vadd.f32 %v3630_v44, %v3629_v43 }
0x1b6d   :  { %v3621_v50 = vadd.f32 %v3620_v47, %v3619_v46  ;;  %v3632_v51 = vrot.slane %v3631_v48, 1 }
0x1b6f   :  { %v3622_v53 = vmul.f32 0.0625, %v3621_v50  ;;  %v3633_v45 = vadd.f32 %v3632_v51, %v3631_v48 }
0x1b71   :  { %v3634_v54 = vmul.f32 0.0625, %v3633_v45  ;;  %v3635_v55 = vmul.f32 %v3622_v53, %v3622_v53  ;;  %v3641_v52 = vsub.f32 %v3608_v31, %v3622_v53  ;;  %v3640_v62 = vsub.f32 %v3607_v25, %v3622_v53 }
0x1b73   :  { %v3636_v56 = vsub.f32 %v3634_v54, %v3635_v55 }
0x1b75   :  { %v3637_v57 = vadd.f32 1e-05, %v3636_v56 }
0x1b77   :  { %4266 = vrsqrt.f32 %v3637_v57 }
0x1b84   :  { %v4267_v59 = vpop.eup %4266 }
0x1b85   :  { %v3639_v49 = vmul.f32 %v4267_v59, %v3791_v60 }
0x1b87   :  { %v3645_v58 = vrot.slane %v3639_v49, %v4637_v28 }
0x1b89   :  { %v3647_v63 = vmul.f32 %v3645_v58, %v3641_v52  ;;  %v3646_v0 = vmul.f32 %v3645_v58, %v3640_v62 }
0x1b8b   :  { %v3654_v1 = vadd.f32 %v3793_v61, %v3646_v0  ;;  %v3655_v2 = vadd.f32 %v3793_v61, %v3647_v63 }
0x1b8d   :  { %3656 = vst.msk [vmem:[#allocation2] sm:$0xff] %vm199_vm7, %v3654_v1  ;;  %3657 = vst.msk [vmem:[#allocation2 + $0x8] sm:$0xff] %vm199_vm7, %v3655_v2 }
0x1b8e   :  { %4279 = shalt.err (!%p4276_p4)
}
0x1b8f   :  { %s4308_s28 = smov 128  }
0x1b90   :  { %3669 = dma.vmem_to_hbm [thread:$0]  %s3664_s6, 256, %s4950_s16, [#allocation3], %s4308_s28, %s4308_s28, %s4958_s5  }
0x1b91   :  { %4288 = dma.done.wait [#allocation3], 256  }
0x1b92   :  { %4289 = vsyncadd [#allocation3], 4294967040 }
0x1b93   :  { %3673 = vsyncpa [#allocation3], 1 }

</bundles_post_ra>
